<compile_context>
chip_gen: v6e
topology: v6e:2x2x1
jax: 0.10.0
libtpu: 0.0.40
codegen_flags: <defaults>
</compile_context>

<pallas_src>
import numpy as np
import jax
import jax.numpy as jnp
from jax.experimental import pallas as pl
from jax.experimental.pallas import tpu as pltpu

# ----------------------------- architecture constants ------------------------
BATCH = 2
C_IN, IMG = 4, 16               # input: [B, 4, 16, 16] (NCHW, like PyTorch)
C1, C2 = 8, 16                  # conv channels (k=3, s=1, p=1, maxpool 2 each)
POOL2_HW = 4                    # spatial size after the two 2x2 pools (16->8->4)
POOL2_S = POOL2_HW * POOL2_HW   # 16
FC_IN = C2 * POOL2_S            # 256
FC_HIDDEN, FC_OUT = 32, 10
BN_EPS = 1e-5

# Embedded conv-stage layout: each sample's feature map lives on a zero-padded
# HP1 x WP1 grid (the 16x16 image sits at rows/cols [1, 17)), flattened onto
# the lane axis.
HP1, WP1 = 20, 32
S1 = HP1 * WP1                  # 640 lanes per sample (multiple of 128)
LANES = BATCH * S1              # 1280 lanes total (10 lane tiles)
CIN_PAD = 8                     # conv input channels padded to one sublane tile
KTAP = 9 * CIN_PAD              # stacked im2col K for both convs (72)

# Trace-time layout guards (review): every 3x3 tap (dilation 1 or 2) of a valid
# output / anchor must stay on the same sample's zero-padded grid, so the
# circular roll wrap never reaches a lane that is actually read.
assert HP1 >= IMG + 3 and WP1 >= IMG + 3
assert S1 % 128 == 0
assert C1 == CIN_PAD  # conv2 tap slabs are exactly (8, 128)-aligned

_VMEM = pl.BlockSpec(memory_space=pltpu.MemorySpace.VMEM)


# ---------------------------------------------------------------------------
# The fused Pallas kernel: conv1+BN+ReLU+pool -> conv2+BN+ReLU+pool -> flatten
# -> FC1+BN+ReLU -> FC2.  Everything stays in VMEM / vregs.
# ---------------------------------------------------------------------------
def _cnn_fused_kernel(x_ref, w1_ref, s1_ref, w2_ref, s2_ref, lat_ref,
                      sel1_ref, sel2_ref, selc_ref,
                      wfc1_ref, sfc1_ref, wfc2_ref, bfc2_ref,
                      out_ref, tap_ref):
    f32 = jnp.float32

    def stack_taps(v, dil):
        # On-the-fly im2col: 9 rolled copies of v ([8, LANES]) written as
        # (8,128)-aligned, lane-dense slabs of the [72, LANES] scratch.
        # shifted[q] = v[q + dil*((kh-1)*WP1 + (kw-1))]; the circular wrap only
        # ever lands on zero-padded / lattice-masked lanes (see trace asserts).
        t = 0
        for kh in range(3):
            for kw in range(3):
                d = dil * ((kh - 1) * WP1 + (kw - 1))
                sh = (-d) % LANES
                tap_ref[pl.ds(CIN_PAD * t, CIN_PAD), :] = (
                    v if sh == 0 else pltpu.roll(v, sh, 1))
                t += 1

    def pool2x2(v, step):
        # max over the 2x2 window ENDING at each lane (anchor = bottom-right);
        # `step` is the lattice spacing in the embedding.
        m = jnp.maximum(v, pltpu.roll(v, step, 1))
        return jnp.maximum(m, pltpu.roll(m, step * WP1, 1))

    # ---- block 1: conv(4->8, 3x3, pad 1) + BN + ReLU + maxpool(2) ------------
    stack_taps(x_ref[...], 1)
    a1 = jnp.dot(w1_ref[...], tap_ref[...], preferred_element_type=f32)
    a1 = jnp.maximum(a1 + s1_ref[...], 0.0)
    # Keep pooled values only on the anchor lattice (even rows/cols 2..16);
    # everything else -- including the ring the dilated conv2 reads -- is 0.
    p1 = pool2x2(a1, 1) * lat_ref[...]

    # ---- block 2: conv(8->16, dilated by 2 on the lattice) + BN + ReLU + pool
    stack_taps(p1, 2)
    a2 = jnp.dot(w2_ref[...], tap_ref[...], preferred_element_type=f32)
    a2 = jnp.maximum(a2 + s2_ref[...], 0.0)
    p2 = pool2x2(a2, 2)

    # ---- MXU-native gather + NCHW flatten (all constants precomputed) -------
    # pd[c, b*16+s]            = pooled feature (b, c, s) at the pool-2 anchors
    # pdb[c, b*256+c'*16+s]    = pd[c, b*16+s]   (column expansion)
    # flat[0, b*256+c*16+s]    = pooled feature (b, c, s)   (channel diagonal)
    pd = jnp.dot(p2, sel1_ref[...], preferred_element_type=f32)      # [C2, B*16]
    pdb = jnp.dot(pd, sel2_ref[...], preferred_element_type=f32)     # [C2, B*256]
    flat = jnp.sum(pdb * selc_ref[...], axis=0, keepdims=True)       # [1, B*256]

    # ---- FC head: Linear + BN + ReLU, then the output Linear ----------------
    # Weights are batch-block-diagonal, so both samples ride one lane-dense row.
    h = jnp.dot(flat, wfc1_ref[...], preferred_element_type=f32) + sfc1_ref[...]
    h = jnp.maximum(h, 0.0)                                          # [1, B*32]
    out_ref[...] = (jnp.dot(h, wfc2_ref[...], preferred_element_type=f32)
                    + bfc2_ref[...])                                 # [1, B*10]


# ---------------------------------------------------------------------------
# Trace-time constant construction.
# ---------------------------------------------------------------------------
def _build_gather_constants():
    lat = np.zeros((1, LANES), np.float32)                    # pool-1 anchor lattice
    sel1 = np.zeros((LANES, BATCH * POOL2_S), np.float32)     # pool-2 anchor gather
    sel2 = np.zeros((BATCH * POOL2_S, BATCH * FC_IN), np.float32)
    selc = np.zeros((C2, BATCH * FC_IN), np.float32)          # channel-diagonal mask
    for b in range(BATCH):
        for r in range(2, IMG + 1, 2):
            for c in range(2, IMG + 1, 2):
                lat[0, b * S1 + r * WP1 + c] = 1.0
        for i in range(POOL2_HW):
            for j in range(POOL2_HW):
                s = i * POOL2_HW + j
                lane = b * S1 + (4 * i + 4) * WP1 + (4 * j + 4)
                sel1[lane, b * POOL2_S + s] = 1.0
        for c in range(C2):
            for s in range(POOL2_S):
                k = b * FC_IN + c * POOL2_S + s                # PyTorch NCHW flatten
                sel2[b * POOL2_S + s, k] = 1.0
                selc[c, k] = 1.0
    return lat, sel1, sel2, selc


_LAT, _SEL1, _SEL2, _SELC = _build_gather_constants()


def _fold_conv_bn_stacked(w, b, bn):
    """Fold BN scale into conv weights and K-stack the 9 taps -> [OC, 72]."""
    gamma, beta, mean, var = bn
    inv = gamma * jax.lax.rsqrt(var + BN_EPS)
    w_f = w * inv[:, None, None, None]
    shift = (b - mean) * inv + beta
    oc, cin = w.shape[0], w.shape[1]
    taps = jnp.transpose(w_f, (0, 2, 3, 1)).reshape(oc, 9, cin)   # [OC, tap, Cin]
    taps = jnp.pad(taps, ((0, 0), (0, 0), (0, CIN_PAD - cin)))    # pad Cin -> 8
    return (taps.reshape(oc, KTAP).astype(jnp.float32),
            shift.reshape(-1, 1).astype(jnp.float32))


def _fold_fc_bn(w, b, bn):
    gamma, beta, mean, var = bn
    inv = gamma * jax.lax.rsqrt(var + BN_EPS)
    return ((w * inv[None, :]).astype(jnp.float32),
            ((b - mean) * inv + beta).astype(jnp.float32))


def _batch_blockdiag(w):
    return jnp.kron(jnp.eye(BATCH, dtype=jnp.float32), w.astype(jnp.float32))


def cnn_forward(params, x):
    """CNN forward pass (inference / eval semantics) as one fused pallas_call."""
    assert x.shape == (BATCH, C_IN, IMG, IMG), x.shape
    # in_quantize_layer: in_bitwidth == 32 -> nn.Identity;  dropout_rate == 0.
    # NCHW -> channels-on-sublanes (padded to 8), embedded spatial on lanes.
    xe = jnp.transpose(x, (1, 0, 2, 3)).astype(jnp.float32)          # [4, B, 16, 16]
    xe = jnp.pad(xe, ((0, CIN_PAD - C_IN), (0, 0),
                      (1, HP1 - IMG - 1), (1, WP1 - IMG - 1)))       # [8, B, 20, 32]
    xe = xe.reshape(CIN_PAD, LANES)

    w1, s1 = _fold_conv_bn_stacked(params["conv1"]["w"], params["conv1"]["b"],
                                   params["conv1"]["bn"])
    w2, s2 = _fold_conv_bn_stacked(params["conv2"]["w"], params["conv2"]["b"],
                                   params["conv2"]["bn"])
    wf1, sf1 = _fold_fc_bn(params["fc1"]["w"], params["fc1"]["b"],
                           params["fc1"]["bn"])
    wf1 = _batch_blockdiag(wf1)                                      # [B*256, B*32]
    sf1 = jnp.tile(sf1, (BATCH,)).reshape(1, -1)                     # [1, B*32]
    wf2 = _batch_blockdiag(params["fc2"]["w"])                       # [B*32, B*10]
    bf2 = jnp.tile(params["fc2"]["b"].astype(jnp.float32),
                   (BATCH,)).reshape(1, -1)                          # [1, B*10]

    lat = jnp.asarray(_LAT)
    sel1 = jnp.asarray(_SEL1)
    sel2 = jnp.asarray(_SEL2)
    selc = jnp.asarray(_SELC)

    out_flat = pl.pallas_call(
        _cnn_fused_kernel,
        out_shape=jax.ShapeDtypeStruct((1, BATCH * FC_OUT), jnp.float32),
        in_specs=[_VMEM] * 13,
        out_specs=_VMEM,
        scratch_shapes=[pltpu.VMEM((KTAP, LANES), jnp.float32)],
    )(xe, w1, s1, w2, s2, lat, sel1, sel2, selc, wf1, sf1, wf2, bf2)
    return out_flat.reshape(BATCH, FC_OUT)


# ---------------------------------------------------------------------------
# Pure-JAX reference (eval-mode BN) used to validate the fused kernel.
# ---------------------------------------------------------------------------
def _cnn_reference(params, x):
    hi = jax.lax.Precision.HIGHEST

    def bn(y, stats, axis):
        gamma, beta, mean, var = stats
        shape = [1] * y.ndim
        shape[axis] = -1
        inv = gamma / jnp.sqrt(var + BN_EPS)
        return (y - mean.reshape(shape)) * inv.reshape(shape) + beta.reshape(shape)

    def conv_block(y, p):
        y = jax.lax.conv_general_dilated(
            y, p["w"], (1, 1), ((1, 1), (1, 1)),
            dimension_numbers=("NCHW", "OIHW", "NCHW"), precision=hi)
        y = y + p["b"][None, :, None, None]
        y = jnp.maximum(bn(y, p["bn"], 1), 0.0)
        b_, c_, h_, w_ = y.shape
        return y.reshape(b_, c_, h_ // 2, 2, w_ // 2, 2).max(axis=(3, 5))

    y = conv_block(x.astype(jnp.float32), params["conv1"])
    y = conv_block(y, params["conv2"])
    y = y.reshape(y.shape[0], -1)
    y = jnp.dot(y, params["fc1"]["w"], precision=hi) + params["fc1"]["b"]
    y = jnp.maximum(bn(y, params["fc1"]["bn"], 1), 0.0)
    return jnp.dot(y, params["fc2"]["w"], precision=hi) + params["fc2"]["b"]


# ---------------------------------------------------------------------------
# Deterministic parameter initialization (arrays only in the jitted pytree).
# ---------------------------------------------------------------------------
def _make_bn(key, c):
    k1, k2, k3, k4 = jax.random.split(key, 4)
    gamma = 1.0 + 0.1 * jax.random.normal(k1, (c,), jnp.float32)
    beta = 0.1 * jax.random.normal(k2, (c,), jnp.float32)
    mean = 0.1 * jax.random.normal(k3, (c,), jnp.float32)
    var = 1.0 + 0.1 * jax.random.uniform(k4, (c,), jnp.float32)
    return (gamma, beta, mean, var)


def init_params(key):
    k = jax.random.split(key, 8)

    def conv_w(kk, oc, ci):
        return jax.random.normal(kk, (oc, ci, 3, 3), jnp.float32) / jnp.sqrt(ci * 9.0)

    def bias(kk, n):
        return 0.1 * jax.random.normal(kk, (n,), jnp.float32)

    params = {
        "conv1": {"w": conv_w(k[0], C1, C_IN), "b": bias(k[1], C1),
                  "bn": _make_bn(k[2], C1)},
        "conv2": {"w": conv_w(k[3], C2, C1), "b": bias(k[4], C2),
                  "bn": _make_bn(k[5], C2)},
    }
    kf = jax.random.split(k[6], 3)
    params["fc1"] = {
        "w": jax.random.normal(kf[0], (FC_IN, FC_HIDDEN), jnp.float32)
             / jnp.sqrt(float(FC_IN)),
        "b": bias(kf[1], FC_HIDDEN),
        "bn": _make_bn(kf[2], FC_HIDDEN),
    }
    ko = jax.random.split(k[7], 2)
    params["fc2"] = {
        "w": jax.random.normal(ko[0], (FC_HIDDEN, FC_OUT), jnp.float32)
             / jnp.sqrt(float(FC_HIDDEN)),
        "b": bias(ko[1], FC_OUT),
    }
    return params


if __name__ == "__main__":
    key = jax.random.PRNGKey(0)
    kp, kx = jax.random.split(key)
    params = init_params(kp)
    x = jax.random.normal(kx, (BATCH, C_IN, IMG, IMG), jnp.float32)  # NCHW

    out = jax.jit(cnn_forward)(params, x)
    out = jax.block_until_ready(out)
    assert out.shape == (BATCH, FC_OUT), out.shape
    assert bool(jnp.all(jnp.isfinite(out)))

    ref = _cnn_reference(params, x)
    max_err = float(jnp.max(jnp.abs(out - ref)))
    assert bool(jnp.allclose(out, ref, rtol=5e-3, atol=5e-3)), max_err

    print("KERNEL_OK")
</pallas_src>

<mosaic_0001>
module attributes {stable_mosaic.version = 11 : i64} {
  func.func @_cnn_fused_kernel(%arg0: memref<8x1280xf32, #tpu.memory_space<vmem>>, %arg1: memref<8x72xf32, #tpu.memory_space<vmem>>, %arg2: memref<8x1xf32, #tpu.memory_space<vmem>>, %arg3: memref<16x72xf32, #tpu.memory_space<vmem>>, %arg4: memref<16x1xf32, #tpu.memory_space<vmem>>, %arg5: memref<1x1280xf32, #tpu.memory_space<vmem>>, %arg6: memref<1280x32xf32, #tpu.memory_space<vmem>>, %arg7: memref<32x512xf32, #tpu.memory_space<vmem>>, %arg8: memref<16x512xf32, #tpu.memory_space<vmem>>, %arg9: memref<512x64xf32, #tpu.memory_space<vmem>>, %arg10: memref<1x64xf32, #tpu.memory_space<vmem>>, %arg11: memref<64x20xf32, #tpu.memory_space<vmem>>, %arg12: memref<1x20xf32, #tpu.memory_space<vmem>>, %arg13: memref<1x20xf32, #tpu.memory_space<vmem>>, %arg14: memref<72x1280xf32, #tpu.memory_space<vmem>>) attributes {dimension_semantics = [], scalar_prefetch = 0 : i64, scratch_operands = 1 : i64, tpu.core_type = #tpu.core_type<tc>} {
    %c0 = arith.constant 0 : index
    %c0_0 = arith.constant 0 : index
    %0 = vector.load %arg0[%c0, %c0_0] : memref<8x1280xf32, #tpu.memory_space<vmem>>, vector<8x1280xf32>
    %c33_i32 = arith.constant 33 : i32
    %1 = tpu.dynamic_rotate %0 by %c33_i32 dim 1 : vector<8x1280xf32>, i32 -> vector<8x1280xf32>
    %c0_1 = arith.constant 0 : index
    %c0_2 = arith.constant 0 : index
    %2 = vector.load %arg14[%c0_1, %c0_2] : memref<72x1280xf32, #tpu.memory_space<vmem>>, vector<8x1280xf32>
    tpu.vector_store %arg14[%c0_1, %c0_2], %1 {strides = array<i32>} : memref<72x1280xf32, #tpu.memory_space<vmem>>, vector<8x1280xf32>,
    %c32_i32 = arith.constant 32 : i32
    %3 = tpu.dynamic_rotate %0 by %c32_i32 dim 1 : vector<8x1280xf32>, i32 -> vector<8x1280xf32>
    %c8 = arith.constant 8 : index
    %c0_3 = arith.constant 0 : index
    %4 = vector.load %arg14[%c8, %c0_3] : memref<72x1280xf32, #tpu.memory_space<vmem>>, vector<8x1280xf32>
    tpu.vector_store %arg14[%c8, %c0_3], %3 {strides = array<i32>} : memref<72x1280xf32, #tpu.memory_space<vmem>>, vector<8x1280xf32>,
    %c31_i32 = arith.constant 31 : i32
    %5 = tpu.dynamic_rotate %0 by %c31_i32 dim 1 : vector<8x1280xf32>, i32 -> vector<8x1280xf32>
    %c16 = arith.constant 16 : index
    %c0_4 = arith.constant 0 : index
    %6 = vector.load %arg14[%c16, %c0_4] : memref<72x1280xf32, #tpu.memory_space<vmem>>, vector<8x1280xf32>
    tpu.vector_store %arg14[%c16, %c0_4], %5 {strides = array<i32>} : memref<72x1280xf32, #tpu.memory_space<vmem>>, vector<8x1280xf32>,
    %c1_i32 = arith.constant 1 : i32
    %7 = tpu.dynamic_rotate %0 by %c1_i32 dim 1 : vector<8x1280xf32>, i32 -> vector<8x1280xf32>
    %c24 = arith.constant 24 : index
    %c0_5 = arith.constant 0 : index
    %8 = vector.load %arg14[%c24, %c0_5] : memref<72x1280xf32, #tpu.memory_space<vmem>>, vector<8x1280xf32>
    tpu.vector_store %arg14[%c24, %c0_5], %7 {strides = array<i32>} : memref<72x1280xf32, #tpu.memory_space<vmem>>, vector<8x1280xf32>,
    %c32 = arith.constant 32 : index
    %c0_6 = arith.constant 0 : index
    %9 = vector.load %arg14[%c32, %c0_6] : memref<72x1280xf32, #tpu.memory_space<vmem>>, vector<8x1280xf32>
    tpu.vector_store %arg14[%c32, %c0_6], %0 {strides = array<i32>} : memref<72x1280xf32, #tpu.memory_space<vmem>>, vector<8x1280xf32>,
    %c1279_i32 = arith.constant 1279 : i32
    %10 = tpu.dynamic_rotate %0 by %c1279_i32 dim 1 : vector<8x1280xf32>, i32 -> vector<8x1280xf32>
    %c40 = arith.constant 40 : index
    %c0_7 = arith.constant 0 : index
    %11 = vector.load %arg14[%c40, %c0_7] : memref<72x1280xf32, #tpu.memory_space<vmem>>, vector<8x1280xf32>
    tpu.vector_store %arg14[%c40, %c0_7], %10 {strides = array<i32>} : memref<72x1280xf32, #tpu.memory_space<vmem>>, vector<8x1280xf32>,
    %c1249_i32 = arith.constant 1249 : i32
    %12 = tpu.dynamic_rotate %0 by %c1249_i32 dim 1 : vector<8x1280xf32>, i32 -> vector<8x1280xf32>
    %c48 = arith.constant 48 : index
    %c0_8 = arith.constant 0 : index
    %13 = vector.load %arg14[%c48, %c0_8] : memref<72x1280xf32, #tpu.memory_space<vmem>>, vector<8x1280xf32>
    tpu.vector_store %arg14[%c48, %c0_8], %12 {strides = array<i32>} : memref<72x1280xf32, #tpu.memory_space<vmem>>, vector<8x1280xf32>,
    %c1248_i32 = arith.constant 1248 : i32
    %14 = tpu.dynamic_rotate %0 by %c1248_i32 dim 1 : vector<8x1280xf32>, i32 -> vector<8x1280xf32>
    %c56 = arith.constant 56 : index
    %c0_9 = arith.constant 0 : index
    %15 = vector.load %arg14[%c56, %c0_9] : memref<72x1280xf32, #tpu.memory_space<vmem>>, vector<8x1280xf32>
    tpu.vector_store %arg14[%c56, %c0_9], %14 {strides = array<i32>} : memref<72x1280xf32, #tpu.memory_space<vmem>>, vector<8x1280xf32>,
    %c1247_i32 = arith.constant 1247 : i32
    %16 = tpu.dynamic_rotate %0 by %c1247_i32 dim 1 : vector<8x1280xf32>, i32 -> vector<8x1280xf32>
    %c64 = arith.constant 64 : index
    %c0_10 = arith.constant 0 : index
    %17 = vector.load %arg14[%c64, %c0_10] : memref<72x1280xf32, #tpu.memory_space<vmem>>, vector<8x1280xf32>
    tpu.vector_store %arg14[%c64, %c0_10], %16 {strides = array<i32>} : memref<72x1280xf32, #tpu.memory_space<vmem>>, vector<8x1280xf32>,
    %c0_11 = arith.constant 0 : index
    %c0_12 = arith.constant 0 : index
    %18 = vector.load %arg1[%c0_11, %c0_12] : memref<8x72xf32, #tpu.memory_space<vmem>>, vector<8x72xf32>
    %c0_13 = arith.constant 0 : index
    %c0_14 = arith.constant 0 : index
    %19 = vector.load %arg14[%c0_13, %c0_14] : memref<72x1280xf32, #tpu.memory_space<vmem>>, vector<72x1280xf32>
    %cst = arith.constant dense<0.000000e+00> : vector<8x1280xf32>
    %20 = tpu.matmul %18, %19, %cst {dimension_numbers = #tpu.dot_dimension_numbers<[1], [0], [0], [1], [0, 0, 1, 1], [], []>} : vector<8x72xf32>, vector<72x1280xf32>, vector<8x1280xf32> -> vector<8x1280xf32>
    %c0_15 = arith.constant 0 : index
    %c0_16 = arith.constant 0 : index
    %21 = vector.load %arg2[%c0_15, %c0_16] : memref<8x1xf32, #tpu.memory_space<vmem>>, vector<8x1xf32>
    %22 = vector.broadcast %21 : vector<8x1xf32> to vector<8x1280xf32>
    %23 = arith.addf %20, %22 : vector<8x1280xf32>
    %cst_17 = arith.constant 0.000000e+00 : f32
    %24 = vector.broadcast %cst_17 : f32 to vector<8x1280xf32>
    %25 = arith.maximumf %23, %24 : vector<8x1280xf32>
    %c1_i32_18 = arith.constant 1 : i32
    %26 = tpu.dynamic_rotate %25 by %c1_i32_18 dim 1 : vector<8x1280xf32>, i32 -> vector<8x1280xf32>
    %27 = arith.maximumf %25, %26 : vector<8x1280xf32>
    %c32_i32_19 = arith.constant 32 : i32
    %28 = tpu.dynamic_rotate %27 by %c32_i32_19 dim 1 : vector<8x1280xf32>, i32 -> vector<8x1280xf32>
    %29 = arith.maximumf %27, %28 : vector<8x1280xf32>
    %c0_20 = arith.constant 0 : index
    %c0_21 = arith.constant 0 : index
    %30 = vector.load %arg5[%c0_20, %c0_21] : memref<1x1280xf32, #tpu.memory_space<vmem>>, vector<1x1280xf32>
    %31 = vector.broadcast %30 : vector<1x1280xf32> to vector<8x1280xf32>
    %32 = arith.mulf %29, %31 : vector<8x1280xf32>
    %c66_i32 = arith.constant 66 : i32
    %33 = tpu.dynamic_rotate %32 by %c66_i32 dim 1 : vector<8x1280xf32>, i32 -> vector<8x1280xf32>
    %c0_22 = arith.constant 0 : index
    %c0_23 = arith.constant 0 : index
    %34 = vector.load %arg14[%c0_22, %c0_23] : memref<72x1280xf32, #tpu.memory_space<vmem>>, vector<8x1280xf32>
    tpu.vector_store %arg14[%c0_22, %c0_23], %33 {strides = array<i32>} : memref<72x1280xf32, #tpu.memory_space<vmem>>, vector<8x1280xf32>,
    %c64_i32 = arith.constant 64 : i32
    %35 = tpu.dynamic_rotate %32 by %c64_i32 dim 1 : vector<8x1280xf32>, i32 -> vector<8x1280xf32>
    %c8_24 = arith.constant 8 : index
    %c0_25 = arith.constant 0 : index
    %36 = vector.load %arg14[%c8_24, %c0_25] : memref<72x1280xf32, #tpu.memory_space<vmem>>, vector<8x1280xf32>
    tpu.vector_store %arg14[%c8_24, %c0_25], %35 {strides = array<i32>} : memref<72x1280xf32, #tpu.memory_space<vmem>>, vector<8x1280xf32>,
    %c62_i32 = arith.constant 62 : i32
    %37 = tpu.dynamic_rotate %32 by %c62_i32 dim 1 : vector<8x1280xf32>, i32 -> vector<8x1280xf32>
    %c16_26 = arith.constant 16 : index
    %c0_27 = arith.constant 0 : index
    %38 = vector.load %arg14[%c16_26, %c0_27] : memref<72x1280xf32, #tpu.memory_space<vmem>>, vector<8x1280xf32>
    tpu.vector_store %arg14[%c16_26, %c0_27], %37 {strides = array<i32>} : memref<72x1280xf32, #tpu.memory_space<vmem>>, vector<8x1280xf32>,
    %c2_i32 = arith.constant 2 : i32
    %39 = tpu.dynamic_rotate %32 by %c2_i32 dim 1 : vector<8x1280xf32>, i32 -> vector<8x1280xf32>
    %c24_28 = arith.constant 24 : index
    %c0_29 = arith.constant 0 : index
    %40 = vector.load %arg14[%c24_28, %c0_29] : memref<72x1280xf32, #tpu.memory_space<vmem>>, vector<8x1280xf32>
    tpu.vector_store %arg14[%c24_28, %c0_29], %39 {strides = array<i32>} : memref<72x1280xf32, #tpu.memory_space<vmem>>, vector<8x1280xf32>,
    %c32_30 = arith.constant 32 : index
    %c0_31 = arith.constant 0 : index
    %41 = vector.load %arg14[%c32_30, %c0_31] : memref<72x1280xf32, #tpu.memory_space<vmem>>, vector<8x1280xf32>
    tpu.vector_store %arg14[%c32_30, %c0_31], %32 {strides = array<i32>} : memref<72x1280xf32, #tpu.memory_space<vmem>>, vector<8x1280xf32>,
    %c1278_i32 = arith.constant 1278 : i32
    %42 = tpu.dynamic_rotate %32 by %c1278_i32 dim 1 : vector<8x1280xf32>, i32 -> vector<8x1280xf32>
    %c40_32 = arith.constant 40 : index
    %c0_33 = arith.constant 0 : index
    %43 = vector.load %arg14[%c40_32, %c0_33] : memref<72x1280xf32, #tpu.memory_space<vmem>>, vector<8x1280xf32>
    tpu.vector_store %arg14[%c40_32, %c0_33], %42 {strides = array<i32>} : memref<72x1280xf32, #tpu.memory_space<vmem>>, vector<8x1280xf32>,
    %c1218_i32 = arith.constant 1218 : i32
    %44 = tpu.dynamic_rotate %32 by %c1218_i32 dim 1 : vector<8x1280xf32>, i32 -> vector<8x1280xf32>
    %c48_34 = arith.constant 48 : index
    %c0_35 = arith.constant 0 : index
    %45 = vector.load %arg14[%c48_34, %c0_35] : memref<72x1280xf32, #tpu.memory_space<vmem>>, vector<8x1280xf32>
    tpu.vector_store %arg14[%c48_34, %c0_35], %44 {strides = array<i32>} : memref<72x1280xf32, #tpu.memory_space<vmem>>, vector<8x1280xf32>,
    %c1216_i32 = arith.constant 1216 : i32
    %46 = tpu.dynamic_rotate %32 by %c1216_i32 dim 1 : vector<8x1280xf32>, i32 -> vector<8x1280xf32>
    %c56_36 = arith.constant 56 : index
    %c0_37 = arith.constant 0 : index
    %47 = vector.load %arg14[%c56_36, %c0_37] : memref<72x1280xf32, #tpu.memory_space<vmem>>, vector<8x1280xf32>
    tpu.vector_store %arg14[%c56_36, %c0_37], %46 {strides = array<i32>} : memref<72x1280xf32, #tpu.memory_space<vmem>>, vector<8x1280xf32>,
    %c1214_i32 = arith.constant 1214 : i32
    %48 = tpu.dynamic_rotate %32 by %c1214_i32 dim 1 : vector<8x1280xf32>, i32 -> vector<8x1280xf32>
    %c64_38 = arith.constant 64 : index
    %c0_39 = arith.constant 0 : index
    %49 = vector.load %arg14[%c64_38, %c0_39] : memref<72x1280xf32, #tpu.memory_space<vmem>>, vector<8x1280xf32>
    tpu.vector_store %arg14[%c64_38, %c0_39], %48 {strides = array<i32>} : memref<72x1280xf32, #tpu.memory_space<vmem>>, vector<8x1280xf32>,
    %c0_40 = arith.constant 0 : index
    %c0_41 = arith.constant 0 : index
    %50 = vector.load %arg3[%c0_40, %c0_41] : memref<16x72xf32, #tpu.memory_space<vmem>>, vector<16x72xf32>
    %c0_42 = arith.constant 0 : index
    %c0_43 = arith.constant 0 : index
    %51 = vector.load %arg14[%c0_42, %c0_43] : memref<72x1280xf32, #tpu.memory_space<vmem>>, vector<72x1280xf32>
    %cst_44 = arith.constant dense<0.000000e+00> : vector<16x1280xf32>
    %52 = tpu.matmul %50, %51, %cst_44 {dimension_numbers = #tpu.dot_dimension_numbers<[1], [0], [0], [1], [0, 0, 1, 1], [], []>} : vector<16x72xf32>, vector<72x1280xf32>, vector<16x1280xf32> -> vector<16x1280xf32>
    %c0_45 = arith.constant 0 : index
    %c0_46 = arith.constant 0 : index
    %53 = vector.load %arg4[%c0_45, %c0_46] : memref<16x1xf32, #tpu.memory_space<vmem>>, vector<16x1xf32>
    %54 = vector.broadcast %53 : vector<16x1xf32> to vector<16x1280xf32>
    %55 = arith.addf %52, %54 : vector<16x1280xf32>
    %cst_47 = arith.constant 0.000000e+00 : f32
    %56 = vector.broadcast %cst_47 : f32 to vector<16x1280xf32>
    %57 = arith.maximumf %55, %56 : vector<16x1280xf32>
    %c2_i32_48 = arith.constant 2 : i32
    %58 = tpu.dynamic_rotate %57 by %c2_i32_48 dim 1 : vector<16x1280xf32>, i32 -> vector<16x1280xf32>
    %59 = arith.maximumf %57, %58 : vector<16x1280xf32>
    %c64_i32_49 = arith.constant 64 : i32
    %60 = tpu.dynamic_rotate %59 by %c64_i32_49 dim 1 : vector<16x1280xf32>, i32 -> vector<16x1280xf32>
    %61 = arith.maximumf %59, %60 : vector<16x1280xf32>
    %c0_50 = arith.constant 0 : index
    %c0_51 = arith.constant 0 : index
    %62 = vector.load %arg6[%c0_50, %c0_51] : memref<1280x32xf32, #tpu.memory_space<vmem>>, vector<1280x32xf32>
    %cst_52 = arith.constant dense<0.000000e+00> : vector<16x32xf32>
    %63 = tpu.matmul %61, %62, %cst_52 {dimension_numbers = #tpu.dot_dimension_numbers<[1], [0], [0], [1], [0, 0, 1, 1], [], []>} : vector<16x1280xf32>, vector<1280x32xf32>, vector<16x32xf32> -> vector<16x32xf32>
    %c0_53 = arith.constant 0 : index
    %c0_54 = arith.constant 0 : index
    %64 = vector.load %arg7[%c0_53, %c0_54] : memref<32x512xf32, #tpu.memory_space<vmem>>, vector<32x512xf32>
    %cst_55 = arith.constant dense<0.000000e+00> : vector<16x512xf32>
    %65 = tpu.matmul %63, %64, %cst_55 {dimension_numbers = #tpu.dot_dimension_numbers<[1], [0], [0], [1], [0, 0, 1, 1], [], []>} : vector<16x32xf32>, vector<32x512xf32>, vector<16x512xf32> -> vector<16x512xf32>
    %c0_56 = arith.constant 0 : index
    %c0_57 = arith.constant 0 : index
    %66 = vector.load %arg8[%c0_56, %c0_57] : memref<16x512xf32, #tpu.memory_space<vmem>>, vector<16x512xf32>
    %67 = arith.mulf %65, %66 : vector<16x512xf32>
    %cst_58 = arith.constant dense<0.000000e+00> : vector<512xf32>
    %68 = vector.multi_reduction <add>, %67, %cst_58 [0] : vector<16x512xf32> to vector<512xf32>
    %69 = vector.shape_cast %68 : vector<512xf32> to vector<1x512xf32>
    %c0_59 = arith.constant 0 : index
    %c0_60 = arith.constant 0 : index
    %70 = vector.load %arg9[%c0_59, %c0_60] : memref<512x64xf32, #tpu.memory_space<vmem>>, vector<512x64xf32>
    %cst_61 = arith.constant dense<0.000000e+00> : vector<1x64xf32>
    %71 = tpu.matmul %69, %70, %cst_61 {dimension_numbers = #tpu.dot_dimension_numbers<[1], [0], [0], [1], [0, 0, 1, 1], [], []>} : vector<1x512xf32>, vector<512x64xf32>, vector<1x64xf32> -> vector<1x64xf32>
    %c0_62 = arith.constant 0 : index
    %c0_63 = arith.constant 0 : index
    %72 = vector.load %arg10[%c0_62, %c0_63] : memref<1x64xf32, #tpu.memory_space<vmem>>, vector<1x64xf32>
    %73 = arith.addf %71, %72 : vector<1x64xf32>
    %cst_64 = arith.constant 0.000000e+00 : f32
    %74 = vector.broadcast %cst_64 : f32 to vector<1x64xf32>
    %75 = arith.maximumf %73, %74 : vector<1x64xf32>
    %c0_65 = arith.constant 0 : index
    %c0_66 = arith.constant 0 : index
    %76 = vector.load %arg11[%c0_65, %c0_66] : memref<64x20xf32, #tpu.memory_space<vmem>>, vector<64x20xf32>
    %cst_67 = arith.constant dense<0.000000e+00> : vector<1x20xf32>
    %77 = tpu.matmul %75, %76, %cst_67 {dimension_numbers = #tpu.dot_dimension_numbers<[1], [0], [0], [1], [0, 0, 1, 1], [], []>} : vector<1x64xf32>, vector<64x20xf32>, vector<1x20xf32> -> vector<1x20xf32>
    %c0_68 = arith.constant 0 : index
    %c0_69 = arith.constant 0 : index
    %78 = vector.load %arg12[%c0_68, %c0_69] : memref<1x20xf32, #tpu.memory_space<vmem>>, vector<1x20xf32>
    %79 = arith.addf %77, %78 : vector<1x20xf32>
    %c0_70 = arith.constant 0 : index
    %c0_71 = arith.constant 0 : index
    %80 = vector.load %arg13[%c0_70, %c0_71] : memref<1x20xf32, #tpu.memory_space<vmem>>, vector<1x20xf32>
    tpu.vector_store %arg13[%c0_70, %c0_71], %79 {strides = array<i32>} : memref<1x20xf32, #tpu.memory_space<vmem>>, vector<1x20xf32>,
    return
  }
}

</mosaic_0001>

<bundles_post_ra>
// kernel: tile.13
= control target key start
LH: loop header
LB: loop body
LE: loop exit
PB: predicated region body
PF: predicated region fallthrough
CT: control target
= control target key end

     0   :  { %s22_s0 = inlined_call_operand.vmem [shape: f32[32], index: 0, kind: input, shape index: {}]   ;;  %s23_s1 = inlined_call_operand.vmem [shape: f32[2,32], index: 1, kind: output, shape index: {}]  }
   0x1   :  { %v4_v0 = vld [vmem:[%s22_s0] ss:$0 sm:$0xff] }
   0x2   :  { %5 = vst [vmem:[%s23_s1] sm:$0x3] %v4_v0 }

// kernel: tile.14
= control target key start
LH: loop header
LB: loop body
LE: loop exit
PB: predicated region body
PF: predicated region fallthrough
CT: control target
= control target key end

     0   :  { %vm8_vm0 = vcmask 261120   ;;  %vm14_vm1 = vcmask 523520   ;;  %s42_s0 = inlined_call_operand.vmem [shape: f32[2,32], index: 0, kind: input, shape index: {}]   ;;  %s43_s1 = inlined_call_operand.vmem [shape: f32[1,64], index: 1, kind: output, shape index: {}]  }
   0x1   :  { %v5_v0 = vld [vmem:[%s42_s0] sm:$0x3]  ;;  %s25_s0 = smov 32  }
   0x2   :  { %6 = vst [vmem:[#allocation1] sm:$0x3] %v5_v0 }
   0x9   :  { %v11_v1 = vld [vmem:[#allocation1 + $0x1] sm:$0x1]   ;;  %v7_v2 = vld [vmem:[#allocation1] sm:$0x1]  }
   0xa   :  { %12 = vrot.lane.b32.xlu0 %v11_v1, %s25_s0  ;;  %9 = vst.msk [vmem:[#allocation0] sm:$0x1] %vm8_vm0, %v7_v2  }
  0x7c   :  { %v13_v3 = vpop.permute.xlu0 %12  }
  0x7d   :  { %15 = vst.msk [vmem:[#allocation0] sm:$0x1] %vm14_vm1, %v13_v3  }
  0x84   :  { %v20_v4 = vld [vmem:[#allocation0] sm:$0x1] }
  0x85   :  { %23 = vst [vmem:[%s43_s1] sm:$0x1] %v20_v4 }

// kernel: tile.18
= control target key start
LH: loop header
LB: loop body
LE: loop exit
PB: predicated region body
PF: predicated region fallthrough
CT: control target
= control target key end

     0   :  { %s22_s0 = inlined_call_operand.vmem [shape: f32[10], index: 0, kind: input, shape index: {}]   ;;  %s23_s1 = inlined_call_operand.vmem [shape: f32[2,10], index: 1, kind: output, shape index: {}]  }
   0x1   :  { %v4_v0 = vld [vmem:[%s22_s0] ss:$0 sm:$0xff] }
   0x2   :  { %5 = vst [vmem:[%s23_s1] sm:$0x3] %v4_v0 }

// kernel: tile.19
= control target key start
LH: loop header
LB: loop body
LE: loop exit
PB: predicated region body
PF: predicated region fallthrough
CT: control target
= control target key end

     0   :  { %vm8_vm0 = vcmask 80896   ;;  %vm14_vm1 = vcmask 162896   ;;  %s42_s0 = inlined_call_operand.vmem [shape: f32[2,10], index: 0, kind: input, shape index: {}]   ;;  %s43_s1 = inlined_call_operand.vmem [shape: f32[1,20], index: 1, kind: output, shape index: {}]  }
   0x1   :  { %v5_v0 = vld [vmem:[%s42_s0] sm:$0x3]  ;;  %s25_s0 = smov 10  }
   0x2   :  { %6 = vst [vmem:[#allocation1] sm:$0x3] %v5_v0 }
   0x9   :  { %v11_v1 = vld [vmem:[#allocation1 + $0x1] sm:$0x1]   ;;  %v7_v2 = vld [vmem:[#allocation1] sm:$0x1]  }
   0xa   :  { %12 = vrot.lane.b32.xlu0 %v11_v1, %s25_s0  ;;  %9 = vst.msk [vmem:[#allocation0] sm:$0x1] %vm8_vm0, %v7_v2  }
  0x7c   :  { %v13_v3 = vpop.permute.xlu0 %12  }
  0x7d   :  { %15 = vst.msk [vmem:[#allocation0] sm:$0x1] %vm14_vm1, %v13_v3  }
  0x84   :  { %v20_v4 = vld [vmem:[#allocation0] sm:$0x1] }
  0x85   :  { %23 = vst [vmem:[%s43_s1] sm:$0x1] %v20_v4 }

// kernel: cnn_forward.1
= control target key start
LH: loop header
LB: loop body
LE: loop exit
PB: predicated region body
PF: predicated region fallthrough
CT: control target
= control target key end

     0   :  { %s3391_s29 = smov 95   ;;  %s3392_s15 = smov 96   ;;  %v3397_v4 = vmov 0.0   ;;  %v3400_v10 = vmov 0   ;;  %v74_v11 = vlaneseq  ;;  %vm491_vm8 = vcmask 588800   ;;  %s5771_s0 = inlined_call_operand.vmem [shape: f32[8,1280], index: 0, kind: input, shape index: {}]   ;;  %s5772_s2 = inlined_call_operand.vmem [shape: f32[8,1], index: 2, kind: input, shape index: {}]   ;;  %s5773_s1 = inlined_call_operand.vmem [shape: f32[8,72], index: 1, kind: input, shape index: {}]   ;;  %s5774_s5 = inlined_call_operand.vmem [shape: f32[1,1280], index: 5, kind: input, shape index: {}]   ;;  %s5775_s4 = inlined_call_operand.vmem [shape: f32[16,1], index: 4, kind: input, shape index: {}]   ;;  %s5776_s3 = inlined_call_operand.vmem [shape: f32[16,72], index: 3, kind: input, shape index: {}]   ;;  %s5777_s6 = inlined_call_operand.vmem [shape: f32[1280,32], index: 6, kind: input, shape index: {}]   ;;  %s5778_s7 = inlined_call_operand.vmem [shape: f32[32,512], index: 7, kind: input, shape index: {}]   ;;  %s5779_s9 = inlined_call_operand.vmem [shape: f32[512,64], index: 9, kind: input, shape index: {}]   ;;  %s5780_s8 = inlined_call_operand.vmem [shape: f32[16,512], index: 8, kind: input, shape index: {}]   ;;  %s5781_s11 = inlined_call_operand.vmem [shape: f32[64,20], index: 11, kind: input, shape index: {}]   ;;  %s5782_s10 = inlined_call_operand.vmem [shape: f32[1,64], index: 10, kind: input, shape index: {}]   ;;  %s5783_s12 = inlined_call_operand.vmem [shape: f32[1,20], index: 12, kind: input, shape index: {}]   ;;  %s5784_s13 = inlined_call_operand.vmem [shape: f32[1,20], index: 13, kind: output, shape index: {}]  }
   0x1   :  { %v3480_v0 = vld [vmem:[%s5771_s0 + $0x8] sm:$0xff]  ;;  %v3485_v1 = vld [vmem:[%s5771_s0] sm:$0xff]  ;;  %v3494_v2 = vld [vmem:[%s5771_s0 + $0x10] sm:$0xff]  ;;  %s3393_s16 = smov 97   ;;  %s3394_s17 = smov 127   ;;  %559 = vmatprep.mubr.f32.mxu0 %v3397_v4  ;;  %630 = vmatprep.mubr.f32.mxu1 %v3397_v4  ;;  %vm2475_vm14 = vcmask 261120  }
   0x2   :  { %355 = vrot.lane.b32.xlu0 %v3480_v0, %s3391_s29  ;;  %353 = vrot.lane.b32.xlu1 %v3485_v1, %s3391_s29  ;;  %s3395_s18 = smov 1   ;;  %v3523_v3 = vld [vmem:[%s5771_s0 + $0x48] sm:$0xff]  ;;  %s3396_s21 = smov 31   ;;  %v3555_v6 = vld [vmem:[%s5771_s0 + $0x30] sm:$0xff]  ;;  %v3641_v12 = vand.u32 127, %v74_v11  ;;  %vm3406_vm15 = vmmov 0  }
   0x3   :  { %s3398_s22 = smov 32   ;;  %s3399_s23 = smov 33   ;;  %v3550_v5 = vld [vmem:[%s5771_s0 + $0x28] sm:$0xff]  ;;  %v3564_v7 = vld [vmem:[%s5771_s0 + $0x20] sm:$0xff]  ;;  %v3593_v8 = vld [vmem:[%s5771_s0 + $0x18] sm:$0xff]  ;;  %3299 = vset.pattern.permute.xlu0 %v3400_v10  ;;  %3300 = vset.pattern.permute.xlu1 %v3400_v10 }
   0x4   :  { %v3626_v9 = vld [vmem:[%s5771_s0 + $0x40] sm:$0xff]  ;;  %vm373_vm0 = vcmp.lt.s32.totalorder %v3641_v12, 95  ;;  %vm332_vm1 = vcmp.lt.s32.totalorder %v3641_v12, 96  ;;  %vm291_vm2 = vcmp.lt.s32.totalorder %v3641_v12, 97  ;;  %v3683_v25 = vld [vmem:[%s5771_s0 + $0x38] sm:$0xff]  ;;  %vm250_vm3 = vcmp.lt.s32.totalorder %v3641_v12, 127 }
   0x5   :  { %vm199_vm4 = vcmp.lt.s32.totalorder %v3641_v12, 1  ;;  %vm158_vm5 = vcmp.lt.s32.totalorder %v3641_v12, 31  ;;  %vm117_vm6 = vcmp.lt.s32.totalorder %v3641_v12, 32  ;;  %vm76_vm7 = vcmp.lt.s32.totalorder %v3641_v12, 33  ;;  %v485_v50 = vld [vmem:[%s5772_s2] sm:$0xff]  ;;  %s3405_s28 = smov 2  }
   0x6   :  { %357 = vrot.lane.b32.xlu0 %v3494_v2, %s3391_s29  ;;  %314 = vrot.lane.b32.xlu1 %v3480_v0, %s3392_s15  ;;  %v3788_v55 = vld [vmem:[%s5773_s1] sm:$0xff]  ;;  %vm1106_vm9 = vcmp.lt.s32.totalorder %v3641_v12, 62  ;;  %vm1065_vm10 = vcmp.lt.s32.totalorder %v3641_v12, 64  ;;  %vm1024_vm11 = vcmp.lt.s32.totalorder %v3641_v12, 66  ;;  %vm1198_vm12 = vcmp.lt.s32.totalorder %v3641_v12, 126 }
   0x7   :  { %vm1147_vm13 = vcmp.lt.s32.totalorder %v3641_v12, 2  ;;  %v2467_v12 = vld [vmem:[%s5778_s7 + $0x40] sm:$0xff] }
   0xa   :  { %316 = vrot.lane.b32.xlu0 %v3494_v2, %s3392_s15  ;;  %312 = vrot.lane.b32.xlu1 %v3485_v1, %s3392_s15 }
   0xe   :  { %273 = vrot.lane.b32.xlu0 %v3480_v0, %s3393_s16  ;;  %275 = vrot.lane.b32.xlu1 %v3494_v2, %s3393_s16 }
  0x12   :  { %271 = vrot.lane.b32.xlu0 %v3485_v1, %s3393_s16  ;;  %232 = vrot.lane.b32.xlu1 %v3480_v0, %s3394_s17 }
  0x16   :  { %234 = vrot.lane.b32.xlu0 %v3494_v2, %s3394_s17  ;;  %230 = vrot.lane.b32.xlu1 %v3485_v1, %s3394_s17 }
  0x1a   :  { %179 = vrot.lane.b32.xlu0 %v3485_v1, %s3395_s18  ;;  %181 = vrot.lane.b32.xlu1 %v3480_v0, %s3395_s18 }
  0x1e   :  { %197 = vrot.lane.b32.xlu0 %v3523_v3, %s3395_s18  ;;  %138 = vrot.lane.b32.xlu1 %v3485_v1, %s3396_s21 }
  0x22   :  { %140 = vrot.lane.b32.xlu0 %v3480_v0, %s3396_s21  ;;  %156 = vrot.lane.b32.xlu1 %v3523_v3, %s3396_s21 }
  0x26   :  { %97 = vrot.lane.b32.xlu0 %v3485_v1, %s3398_s22  ;;  %99 = vrot.lane.b32.xlu1 %v3480_v0, %s3398_s22 }
  0x2a   :  { %115 = vrot.lane.b32.xlu0 %v3523_v3, %s3398_s22  ;;  %54 = vrot.lane.b32.xlu1 %v3485_v1, %s3399_s23 }
  0x2e   :  { %56 = vrot.lane.b32.xlu0 %v3480_v0, %s3399_s23  ;;  %72 = vrot.lane.b32.xlu1 %v3523_v3, %s3399_s23 }
  0x32   :  { %363 = vrot.lane.b32.xlu0 %v3550_v5, %s3391_s29  ;;  %365 = vrot.lane.b32.xlu1 %v3555_v6, %s3391_s29 }
  0x36   :  { %361 = vrot.lane.b32.xlu0 %v3564_v7, %s3391_s29  ;;  %322 = vrot.lane.b32.xlu1 %v3550_v5, %s3392_s15 }
  0x3a   :  { %324 = vrot.lane.b32.xlu0 %v3555_v6, %s3392_s15  ;;  %320 = vrot.lane.b32.xlu1 %v3564_v7, %s3392_s15 }
  0x3e   :  { %281 = vrot.lane.b32.xlu0 %v3550_v5, %s3393_s16  ;;  %283 = vrot.lane.b32.xlu1 %v3555_v6, %s3393_s16 }
  0x42   :  { %279 = vrot.lane.b32.xlu0 %v3564_v7, %s3393_s16  ;;  %240 = vrot.lane.b32.xlu1 %v3550_v5, %s3394_s17 }
  0x46   :  { %242 = vrot.lane.b32.xlu0 %v3555_v6, %s3394_s17  ;;  %238 = vrot.lane.b32.xlu1 %v3564_v7, %s3394_s17 }
  0x4a   :  { %187 = vrot.lane.b32.xlu0 %v3564_v7, %s3395_s18  ;;  %189 = vrot.lane.b32.xlu1 %v3550_v5, %s3395_s18 }
  0x4e   :  { %185 = vrot.lane.b32.xlu0 %v3593_v8, %s3395_s18  ;;  %359 = vrot.lane.b32.xlu1 %v3593_v8, %s3391_s29 }
  0x52   :  { %146 = vrot.lane.b32.xlu0 %v3564_v7, %s3396_s21  ;;  %148 = vrot.lane.b32.xlu1 %v3550_v5, %s3396_s21 }
  0x56   :  { %144 = vrot.lane.b32.xlu0 %v3593_v8, %s3396_s21  ;;  %318 = vrot.lane.b32.xlu1 %v3593_v8, %s3392_s15 }
  0x5a   :  { %105 = vrot.lane.b32.xlu0 %v3564_v7, %s3398_s22  ;;  %107 = vrot.lane.b32.xlu1 %v3550_v5, %s3398_s22 }
  0x5e   :  { %103 = vrot.lane.b32.xlu0 %v3593_v8, %s3398_s22  ;;  %277 = vrot.lane.b32.xlu1 %v3593_v8, %s3393_s16 }
  0x62   :  { %62 = vrot.lane.b32.xlu0 %v3564_v7, %s3399_s23  ;;  %64 = vrot.lane.b32.xlu1 %v3550_v5, %s3399_s23 }
  0x66   :  { %60 = vrot.lane.b32.xlu0 %v3593_v8, %s3399_s23  ;;  %236 = vrot.lane.b32.xlu1 %v3593_v8, %s3394_s17 }
  0x6a   :  { %371 = vrot.lane.b32.xlu0 %v3523_v3, %s3391_s29  ;;  %369 = vrot.lane.b32.xlu1 %v3626_v9, %s3391_s29 }
  0x6e   :  { %330 = vrot.lane.b32.xlu0 %v3523_v3, %s3392_s15  ;;  %183 = vrot.lane.b32.xlu1 %v3494_v2, %s3395_s18 }
  0x72   :  { %328 = vrot.lane.b32.xlu0 %v3626_v9, %s3392_s15  ;;  %289 = vrot.lane.b32.xlu1 %v3523_v3, %s3393_s16 }
  0x74   :  { %v356_v13 = vpop.permute.xlu0 %355  ;;  %v3643_v14 = vpop.permute.xlu1 %353 }
  0x75   :  { %v382_v18 = vsel %vm373_vm0, %v3643_v14, %v356_v13 }
  0x76   :  { %142 = vrot.lane.b32.xlu0 %v3494_v2, %s3396_s21  ;;  %287 = vrot.lane.b32.xlu1 %v3626_v9, %s3393_s16 }
  0x78   :  { %v3650_v15 = vpop.permute.xlu0 %357  ;;  %v315_v16 = vpop.permute.xlu1 %314 }
  0x79   :  { %v381_v17 = vsel %vm373_vm0, %v356_v13, %v3650_v15 }
  0x7a   :  { %509 = vmatprep.subr.mxu0 %v381_v17  ;;  %248 = vrot.lane.b32.xlu0 %v3523_v3, %s3394_s17 }
  0x7b   :  { %101 = vrot.lane.b32.xlu1 %v3494_v2, %s3398_s22  ;;  %510 = vmatpush1.msra.mxu0 %v382_v18 }
  0x7c   :  { %v3663_v19 = vpop.permute.xlu0 %316  ;;  %v3665_v20 = vpop.permute.xlu1 %312 }
  0x7d   :  { %v340_v21 = vsel %vm332_vm1, %v315_v16, %v3663_v19  ;;  %v341_v22 = vsel %vm332_vm1, %v3665_v20, %v315_v16 }
  0x7e   :  { %246 = vrot.lane.b32.xlu0 %v3626_v9, %s3394_s17  ;;  %511 = vmatprep.subr.mxu0 %v340_v21 }
  0x7f   :  { %58 = vrot.lane.b32.xlu1 %v3494_v2, %s3399_s23  ;;  %512 = vmatpush1.msra.mxu0 %v341_v22 }
  0x80   :  { %v274_v23 = vpop.permute.xlu0 %273  ;;  %v3678_v24 = vpop.permute.xlu1 %275 }
  0x81   :  { %v299_v26 = vsel %vm291_vm2, %v274_v23, %v3678_v24 }
  0x82   :  { %195 = vrot.lane.b32.xlu0 %v3626_v9, %s3395_s18  ;;  %513 = vmatprep.subr.mxu0 %v299_v26 }
  0x83   :  { %193 = vrot.lane.b32.xlu1 %v3683_v25, %s3395_s18 }
  0x84   :  { %v3692_v27 = vpop.permute.xlu0 %271  ;;  %v233_v28 = vpop.permute.xlu1 %232 }
  0x85   :  { %v300_v29 = vsel %vm291_vm2, %v3692_v27, %v274_v23 }
  0x86   :  { %367 = vrot.lane.b32.xlu0 %v3683_v25, %s3391_s29  ;;  %514 = vmatpush1.msra.mxu0 %v300_v29 }
  0x87   :  { %154 = vrot.lane.b32.xlu1 %v3626_v9, %s3396_s21 }
  0x88   :  { %v3702_v30 = vpop.permute.xlu0 %234  ;;  %v3704_v31 = vpop.permute.xlu1 %230 }
  0x89   :  { %v258_v32 = vsel %vm250_vm3, %v233_v28, %v3702_v30  ;;  %v259_v33 = vsel %vm250_vm3, %v3704_v31, %v233_v28 }
  0x8a   :  { %152 = vrot.lane.b32.xlu0 %v3683_v25, %s3396_s21  ;;  %515 = vmatprep.subr.mxu0 %v258_v32 }
  0x8b   :  { %326 = vrot.lane.b32.xlu1 %v3683_v25, %s3392_s15  ;;  %516 = vmatpush1.msra.mxu0 %v259_v33 }
  0x8c   :  { %v180_v34 = vpop.permute.xlu0 %179  ;;  %517 = vmatprep.subr.mxu0 %v3480_v0  ;;  %v3718_v35 = vpop.permute.xlu1 %181 }
  0x8d   :  { %518 = vmatpush1.msra.mxu0 %v3485_v1  ;;  %v208_v36 = vsel %vm199_vm4, %v180_v34, %v3718_v35 }
  0x8e   :  { %113 = vrot.lane.b32.xlu0 %v3626_v9, %s3398_s22  ;;  %519 = vmatprep.subr.mxu0 %v208_v36 }
  0x8f   :  { %111 = vrot.lane.b32.xlu1 %v3683_v25, %s3398_s22 }
  0x90   :  { %v3728_v37 = vpop.permute.xlu0 %197  ;;  %v139_v38 = vpop.permute.xlu1 %138 }
  0x91   :  { %v209_v39 = vsel %vm199_vm4, %v3728_v37, %v180_v34 }
  0x92   :  { %285 = vrot.lane.b32.xlu0 %v3683_v25, %s3393_s16  ;;  %520 = vmatpush1.msra.mxu0 %v209_v39 }
  0x93   :  { %70 = vrot.lane.b32.xlu1 %v3626_v9, %s3399_s23 }
  0x94   :  { %v3738_v40 = vpop.permute.xlu0 %140  ;;  %v3740_v41 = vpop.permute.xlu1 %156 }
  0x95   :  { %v167_v42 = vsel %vm158_vm5, %v139_v38, %v3738_v40  ;;  %v168_v43 = vsel %vm158_vm5, %v3740_v41, %v139_v38 }
  0x96   :  { %68 = vrot.lane.b32.xlu0 %v3683_v25, %s3399_s23  ;;  %521 = vmatprep.subr.mxu0 %v167_v42 }
  0x97   :  { %244 = vrot.lane.b32.xlu1 %v3683_v25, %s3394_s17  ;;  %522 = vmatpush1.msra.mxu0 %v168_v43  ;;  %s3401_s17 = smov 64  }
  0x98   :  { %v98_v44 = vpop.permute.xlu0 %97  ;;  %v3753_v45 = vpop.permute.xlu1 %99 }
  0x99   :  { %v126_v46 = vsel %vm117_vm6, %v98_v44, %v3753_v45 }
  0x9a   :  { %191 = vrot.lane.b32.xlu0 %v3555_v6, %s3395_s18  ;;  %523 = vmatprep.subr.mxu0 %v126_v46 }
  0x9b   :  { %150 = vrot.lane.b32.xlu1 %v3555_v6, %s3396_s21  ;;  %s3403_s21 = smov 126  }
  0x9c   :  { %v3762_v47 = vpop.permute.xlu0 %115  ;;  %v55_v48 = vpop.permute.xlu1 %54 }
  0x9d   :  { %v127_v49 = vsel %vm117_vm6, %v3762_v47, %v98_v44 }
  0x9e   :  { %109 = vrot.lane.b32.xlu0 %v3555_v6, %s3398_s22  ;;  %524 = vmatpush1.msra.mxu0 %v127_v49 }
  0x9f   :  { %66 = vrot.lane.b32.xlu1 %v3555_v6, %s3399_s23 }
  0xa0   :  { %v3775_v51 = vpop.permute.xlu0 %56  ;;  %v3777_v52 = vpop.permute.xlu1 %72 }
  0xa1   :  { %v85_v53 = vsel %vm76_vm7, %v55_v48, %v3775_v51  ;;  %v86_v54 = vsel %vm76_vm7, %v3777_v52, %v55_v48 }
  0xa2   :  { %525 = vmatprep.subr.mxu0 %v85_v53  ;;  %488 = vperm.xlu0 %3299, %v485_v50  }
  0xa3   :  { %526 = vmatpush1.msra.mxu0 %v86_v54 }
  0xa4   :  { %v364_v56 = vpop.permute.xlu0 %363  ;;  %2975 = vmatmul.mubr.msk.f32.vlgmr.msra.gmra.mxu0 %vm491_vm8, %v3788_v55  ;;  %v3792_v57 = vpop.permute.xlu1 %365 }
  0xa5   :  { %v377_v58 = vsel %vm373_vm0, %v364_v56, %v3792_v57  ;;  %701 = vmatprep.mubr.f32.mxu0 %v3397_v4 }
  0xa6   :  { %651 = vmatprep.subr.mxu0 %v377_v58 }
  0xa8   :  { %v362_v59 = vpop.permute.xlu0 %361  ;;  %v323_v60 = vpop.permute.xlu1 %322 }
  0xa9   :  { %v378_v61 = vsel %vm373_vm0, %v362_v59, %v364_v56 }
  0xaa   :  { %652 = vmatpush1.msra.mxu0 %v378_v61 }
  0xac   :  { %v3800_v62 = vpop.permute.xlu0 %324  ;;  %v321_v63 = vpop.permute.xlu1 %320 }
  0xad   :  { %v336_v0 = vsel %vm332_vm1, %v323_v60, %v3800_v62  ;;  %v337_v1 = vsel %vm332_vm1, %v321_v63, %v323_v60 }
  0xae   :  { %653 = vmatprep.subr.mxu0 %v336_v0 }
  0xaf   :  { %654 = vmatpush1.msra.mxu0 %v337_v1 }
  0xb0   :  { %v282_v10 = vpop.permute.xlu0 %281  ;;  %v3807_v13 = vpop.permute.xlu1 %283 }
  0xb1   :  { %v295_v16 = vsel %vm291_vm2, %v282_v10, %v3807_v13 }
  0xb2   :  { %655 = vmatprep.subr.mxu0 %v295_v16 }
  0xb4   :  { %v280_v17 = vpop.permute.xlu0 %279  ;;  %v241_v18 = vpop.permute.xlu1 %240 }
  0xb5   :  { %v296_v21 = vsel %vm291_vm2, %v280_v17, %v282_v10 }
  0xb6   :  { %656 = vmatpush1.msra.mxu0 %v296_v21 }
  0xb8   :  { %v3814_v22 = vpop.permute.xlu0 %242  ;;  %v239_v23 = vpop.permute.xlu1 %238 }
  0xb9   :  { %v254_v26 = vsel %vm250_vm3, %v241_v18, %v3814_v22  ;;  %v255_v28 = vsel %vm250_vm3, %v239_v23, %v241_v18 }
  0xba   :  { %657 = vmatprep.subr.mxu0 %v254_v26 }
  0xbb   :  { %658 = vmatpush1.msra.mxu0 %v255_v28 }
  0xbc   :  { %v188_v29 = vpop.permute.xlu0 %187  ;;  %659 = vmatprep.subr.mxu0 %v3550_v5  ;;  %v3822_v32 = vpop.permute.xlu1 %189 }
  0xbd   :  { %660 = vmatpush1.msra.mxu0 %v3564_v7  ;;  %v204_v33 = vsel %vm199_vm4, %v188_v29, %v3822_v32 }
  0xbe   :  { %661 = vmatprep.subr.mxu0 %v204_v33 }
  0xc0   :  { %v186_v34 = vpop.permute.xlu0 %185  ;;  %v360_v36 = vpop.permute.xlu1 %359 }
  0xc1   :  { %v379_v38 = vsel %vm373_vm0, %v360_v36, %v362_v59  ;;  %v205_v39 = vsel %vm199_vm4, %v186_v34, %v188_v29  ;;  %v380_v5 = vsel %vm373_vm0, %v3650_v15, %v360_v36 }
  0xc2   :  { %580 = vmatprep.subr.mxu1 %v379_v38  ;;  %662 = vmatpush1.msra.mxu0 %v205_v39 }
  0xc3   :  { %581 = vmatpush1.msra.mxu1 %v380_v5 }
  0xc4   :  { %v147_v7 = vpop.permute.xlu0 %146  ;;  %v3835_v42 = vpop.permute.xlu1 %148 }
  0xc5   :  { %v163_v43 = vsel %vm158_vm5, %v147_v7, %v3835_v42 }
  0xc6   :  { %663 = vmatprep.subr.mxu0 %v163_v43 }
  0xc8   :  { %v145_v44 = vpop.permute.xlu0 %144  ;;  %v319_v46 = vpop.permute.xlu1 %318 }
  0xc9   :  { %v338_v48 = vsel %vm332_vm1, %v319_v46, %v321_v63  ;;  %v164_v49 = vsel %vm158_vm5, %v145_v44, %v147_v7  ;;  %v339_v15 = vsel %vm332_vm1, %v3663_v19, %v319_v46 }
  0xca   :  { %582 = vmatprep.subr.mxu1 %v338_v48  ;;  %664 = vmatpush1.msra.mxu0 %v164_v49 }
  0xcb   :  { %583 = vmatpush1.msra.mxu1 %v339_v15 }
  0xcc   :  { %v106_v50 = vpop.permute.xlu0 %105  ;;  %v3847_v53 = vpop.permute.xlu1 %107 }
  0xcd   :  { %v122_v54 = vsel %vm117_vm6, %v106_v50, %v3847_v53 }
  0xce   :  { %665 = vmatprep.subr.mxu0 %v122_v54 }
  0xd0   :  { %v104_v56 = vpop.permute.xlu0 %103  ;;  %v278_v58 = vpop.permute.xlu1 %277 }
  0xd1   :  { %v297_v59 = vsel %vm291_vm2, %v278_v58, %v280_v17  ;;  %v123_v60 = vsel %vm117_vm6, %v104_v56, %v106_v50  ;;  %v298_v19 = vsel %vm291_vm2, %v3678_v24, %v278_v58 }
  0xd2   :  { %584 = vmatprep.subr.mxu1 %v297_v59  ;;  %666 = vmatpush1.msra.mxu0 %v123_v60 }
  0xd3   :  { %585 = vmatpush1.msra.mxu1 %v298_v19 }
  0xd4   :  { %v63_v61 = vpop.permute.xlu0 %62  ;;  %v3859_v63 = vpop.permute.xlu1 %64 }
  0xd5   :  { %v81_v0 = vsel %vm76_vm7, %v63_v61, %v3859_v63 }
  0xd6   :  { %667 = vmatprep.subr.mxu0 %v81_v0 }
  0xd8   :  { %v61_v1 = vpop.permute.xlu0 %60  ;;  %v237_v10 = vpop.permute.xlu1 %236 }
  0xd9   :  { %v256_v16 = vsel %vm250_vm3, %v237_v10, %v239_v23  ;;  %v82_v17 = vsel %vm76_vm7, %v61_v1, %v63_v61  ;;  %v257_v24 = vsel %vm250_vm3, %v3702_v30, %v237_v10 }
  0xda   :  { %586 = vmatprep.subr.mxu1 %v256_v16  ;;  %668 = vmatpush1.msra.mxu0 %v82_v17 }
  0xdb   :  { %587 = vmatpush1.msra.mxu1 %v257_v24  ;;  %2977 = vmatmul.mubr.msk.f32.vlgmr.msra.gmra.mxu0 %vm491_vm8, %v3788_v55 }
  0xdc   :  { %v372_v18 = vpop.permute.xlu0 %371  ;;  %v370_v21 = vpop.permute.xlu1 %369  ;;  %588 = vmatprep.subr.mxu1 %v3593_v8  ;;  %843 = vmatprep.mubr.f32.mxu0 %v3397_v4 }
  0xdd   :  { %v383_v23 = vsel %vm373_vm0, %v372_v18, %v3643_v14  ;;  %v374_v26 = vsel %vm373_vm0, %v370_v21, %v372_v18  ;;  %589 = vmatpush1.msra.mxu1 %v3494_v2 }
  0xde   :  { %793 = vmatprep.subr.mxu0 %v383_v23 }
  0xdf   :  { %794 = vmatpush1.msra.mxu0 %v374_v26 }
  0xe0   :  { %v331_v30 = vpop.permute.xlu0 %330  ;;  %v184_v28 = vpop.permute.xlu1 %183 }
  0xe1   :  { %v206_v29 = vsel %vm199_vm4, %v184_v28, %v186_v34  ;;  %v342_v8 = vsel %vm332_vm1, %v331_v30, %v3665_v20  ;;  %v207_v14 = vsel %vm199_vm4, %v3718_v35, %v184_v28 }
  0xe2   :  { %590 = vmatprep.subr.mxu1 %v206_v29  ;;  %795 = vmatprep.subr.mxu0 %v342_v8 }
  0xe3   :  { %591 = vmatpush1.msra.mxu1 %v207_v14 }
  0xe4   :  { %v329_v33 = vpop.permute.xlu0 %328  ;;  %v290_v2 = vpop.permute.xlu1 %289 }
  0xe5   :  { %v333_v36 = vsel %vm332_vm1, %v329_v33, %v331_v30  ;;  %v301_v34 = vsel %vm291_vm2, %v290_v2, %v3692_v27 }
  0xe6   :  { %796 = vmatpush1.msra.mxu0 %v333_v36 }
  0xe7   :  { %797 = vmatprep.subr.mxu0 %v301_v34 }
  0xe8   :  { %v143_v38 = vpop.permute.xlu0 %142  ;;  %v288_v20 = vpop.permute.xlu1 %287 }
  0xe9   :  { %v165_v39 = vsel %vm158_vm5, %v143_v38, %v145_v44  ;;  %v292_v35 = vsel %vm291_vm2, %v288_v20, %v290_v2  ;;  %v166_v5 = vsel %vm158_vm5, %v3738_v40, %v143_v38 }
  0xea   :  { %592 = vmatprep.subr.mxu1 %v165_v39  ;;  %798 = vmatpush1.msra.mxu0 %v292_v35 }
  0xeb   :  { %593 = vmatpush1.msra.mxu1 %v166_v5 }
  0xec   :  { %v249_v7 = vpop.permute.xlu0 %248 }
  0xed   :  { %v102_v43 = vpop.permute.xlu1 %101  ;;  %v260_v27 = vsel %vm250_vm3, %v249_v7, %v3704_v31 }
  0xee   :  { %v124_v46 = vsel %vm117_vm6, %v102_v43, %v104_v56  ;;  %799 = vmatprep.subr.mxu0 %v260_v27  ;;  %v125_v44 = vsel %vm117_vm6, %v3753_v45, %v102_v43 }
  0xef   :  { %594 = vmatprep.subr.mxu1 %v124_v46 }
  0xf0   :  { %595 = vmatpush1.msra.mxu1 %v125_v44  ;;  %v247_v40 = vpop.permute.xlu0 %246 }
  0xf1   :  { %v59_v48 = vpop.permute.xlu1 %58  ;;  %v251_v49 = vsel %vm250_vm3, %v247_v40, %v249_v7 }
  0xf2   :  { %v83_v15 = vsel %vm76_vm7, %v59_v48, %v61_v1  ;;  %800 = vmatpush1.msra.mxu0 %v251_v49  ;;  %v84_v31 = vsel %vm76_vm7, %v3775_v51, %v59_v48 }
  0xf3   :  { %596 = vmatprep.subr.mxu1 %v83_v15  ;;  %801 = vmatprep.subr.mxu0 %v3523_v3 }
  0xf4   :  { %597 = vmatpush1.msra.mxu1 %v84_v31  ;;  %v196_v45 = vpop.permute.xlu0 %195  ;;  %802 = vmatpush1.msra.mxu0 %v3626_v9 }
  0xf5   :  { %2976 = vmatmul.mubr.msk.f32.vlgmr.msra.gmra.mxu1 %vm491_vm8, %v3788_v55  ;;  %v194_v50 = vpop.permute.xlu1 %193  ;;  %v200_v54 = vsel %vm199_vm4, %v196_v45, %v3728_v37 }
  0xf6   :  { %803 = vmatprep.subr.mxu0 %v200_v54  ;;  %v201_v56 = vsel %vm199_vm4, %v194_v50, %v196_v45  ;;  %772 = vmatprep.mubr.f32.mxu1 %v3397_v4 }
  0xf7   :  { %804 = vmatpush1.msra.mxu0 %v201_v56 }
  0xf8   :  { %v368_v3 = vpop.permute.xlu0 %367 }
  0xf9   :  { %v155_v51 = vpop.permute.xlu1 %154  ;;  %v375_v9 = vsel %vm373_vm0, %v368_v3, %v370_v21  ;;  %v376_v58 = vsel %vm373_vm0, %v3792_v57, %v368_v3  ;;  %vm2895_vm0 = vcmask 523264  }
  0xfa   :  { %722 = vmatprep.subr.mxu1 %v375_v9  ;;  %v159_v37 = vsel %vm158_vm5, %v155_v51, %v3740_v41 }
  0xfb   :  { %805 = vmatprep.subr.mxu0 %v159_v37  ;;  %723 = vmatpush1.msra.mxu1 %v376_v58 }
  0xfc   :  { %v153_v59 = vpop.permute.xlu0 %152 }
  0xfd   :  { %v327_v60 = vpop.permute.xlu1 %326  ;;  %v160_v19 = vsel %vm158_vm5, %v153_v59, %v155_v51 }
  0xfe   :  { %v334_v61 = vsel %vm332_vm1, %v327_v60, %v329_v33  ;;  %806 = vmatpush1.msra.mxu0 %v160_v19  ;;  %v335_v57 = vsel %vm332_vm1, %v3800_v62, %v327_v60  ;;  %vm2969_vm1 = vcmask 155648  }
  0xff   :  { %724 = vmatprep.subr.mxu1 %v334_v61 }
 0x100   :  { %725 = vmatpush1.msra.mxu1 %v335_v57  ;;  %v114_v0 = vpop.permute.xlu0 %113 }
 0x101   :  { %v112_v1 = vpop.permute.xlu1 %111  ;;  %v118_v41 = vsel %vm117_vm6, %v114_v0, %v3762_v47 }
 0x102   :  { %807 = vmatprep.subr.mxu0 %v118_v41  ;;  %v119_v10 = vsel %vm117_vm6, %v112_v1, %v114_v0 }
 0x103   :  { %808 = vmatpush1.msra.mxu0 %v119_v10 }
 0x104   :  { %v286_v16 = vpop.permute.xlu0 %285 }
 0x105   :  { %v71_v17 = vpop.permute.xlu1 %70  ;;  %v293_v24 = vsel %vm291_vm2, %v286_v16, %v288_v20  ;;  %v294_v62 = vsel %vm291_vm2, %v3807_v13, %v286_v16 }
 0x106   :  { %726 = vmatprep.subr.mxu1 %v293_v24  ;;  %v77_v18 = vsel %vm76_vm7, %v71_v17, %v3777_v52 }
 0x107   :  { %809 = vmatprep.subr.mxu0 %v77_v18  ;;  %727 = vmatpush1.msra.mxu1 %v294_v62 }
 0x108   :  { %v69_v47 = vpop.permute.xlu0 %68 }
 0x109   :  { %v245_v21 = vpop.permute.xlu1 %244  ;;  %v78_v23 = vsel %vm76_vm7, %v69_v47, %v71_v17 }
 0x10a   :  { %v252_v26 = vsel %vm250_vm3, %v245_v21, %v247_v40  ;;  %810 = vmatpush1.msra.mxu0 %v78_v23  ;;  %v253_v13 = vsel %vm250_vm3, %v3814_v22, %v245_v21 }
 0x10b   :  { %728 = vmatprep.subr.mxu1 %v252_v26  ;;  %2979 = vmatmul.mubr.msk.f32.vlgmr.msra.gmra.mxu0 %vm491_vm8, %v3788_v55 }
 0x10c   :  { %729 = vmatpush1.msra.mxu1 %v253_v13  ;;  %v192_v52 = vpop.permute.xlu0 %191  ;;  %1500 = vmatprep.mubr.f32.mxu0 %v3397_v4 }
 0x10d   :  { %v203_v30 = vsel %vm199_vm4, %v3822_v32, %v192_v52  ;;  %730 = vmatprep.subr.mxu1 %v3683_v25  ;;  %v151_v28 = vpop.permute.xlu1 %150  ;;  %v202_v29 = vsel %vm199_vm4, %v192_v52, %v194_v50 }
 0x10e   :  { %731 = vmatpush1.msra.mxu1 %v3555_v6  ;;  %v161_v8 = vsel %vm158_vm5, %v151_v28, %v153_v59  ;;  %v162_v25 = vsel %vm158_vm5, %v3835_v42, %v151_v28 }
 0x10f   :  { %732 = vmatprep.subr.mxu1 %v202_v29 }
 0x110   :  { %733 = vmatpush1.msra.mxu1 %v203_v30  ;;  %v110_v22 = vpop.permute.xlu0 %109 }
 0x111   :  { %v121_v14 = vsel %vm117_vm6, %v3847_v53, %v110_v22  ;;  %734 = vmatprep.subr.mxu1 %v161_v8  ;;  %v67_v32 = vpop.permute.xlu1 %66  ;;  %v120_v33 = vsel %vm117_vm6, %v110_v22, %v112_v1 }
 0x112   :  { %735 = vmatpush1.msra.mxu1 %v162_v25  ;;  %v79_v6 = vsel %vm76_vm7, %v67_v32, %v69_v47  ;;  %v80_v2 = vsel %vm76_vm7, %v3859_v63, %v67_v32 }
 0x113   :  { %736 = vmatprep.subr.mxu1 %v120_v33 }
 0x114   :  { %737 = vmatpush1.msra.mxu1 %v121_v14 }
 0x115   :  { %738 = vmatprep.subr.mxu1 %v79_v6 }
 0x116   :  { %739 = vmatpush1.msra.mxu1 %v80_v2 }
 0x117   :  { %2978 = vmatmul.mubr.msk.f32.vlgmr.msra.gmra.mxu1 %vm491_vm8, %v3788_v55 }
 0x118   :  { %1423 = vmatprep.mubr.f32.mxu1 %v3397_v4 }
 0x11d   :  { %v489_v42 = vpop.permute.xlu0 %488 }
 0x164   :  { %v561_v53 = vpop.f32.mrf.mxu0 }
 0x165   :  { %v562_v36 = vadd.f32 %v561_v53, %v489_v42 }
 0x166   :  { %v563_v34 = vpop.f32.mrf.mxu0 }
 0x167   :  { %v850_v38 = vmax.f32 %v562_v36, 0.0  ;;  %v564_v20 = vadd.f32 %v563_v34, %v489_v42  ;;  %v4054_v34 = vld [vmem:[%s5774_s5] sm:$0xff] }
 0x169   :  { %v851_v39 = vmax.f32 %v564_v20, 0.0  ;;  %860 = vrot.lane.b32.xlu1 %v850_v38, %s3395_s18 }
 0x16d   :  { %862 = vrot.lane.b32.xlu1 %v851_v39, %s3395_s18 }
 0x19b   :  { %v703_v7 = vpop.f32.mrf.mxu0 }
 0x19c   :  { %v704_v51 = vadd.f32 %v703_v7, %v489_v42 }
 0x19d   :  { %v705_v55 = vpop.f32.mrf.mxu0 }
 0x19e   :  { %v706_v31 = vadd.f32 %v705_v55, %v489_v42  ;;  %v854_v37 = vmax.f32 %v704_v51, 0.0 }
 0x1a0   :  { %v855_v50 = vmax.f32 %v706_v31, 0.0 }
 0x1b5   :  { %v632_v35 = vpop.f32.mrf.mxu1 }
 0x1b6   :  { %v633_v63 = vadd.f32 %v632_v35, %v489_v42 }
 0x1b7   :  { %v634_v43 = vpop.f32.mrf.mxu1 }
 0x1b8   :  { %v852_v5 = vmax.f32 %v633_v63, 0.0  ;;  %v635_v40 = vadd.f32 %v634_v43, %v489_v42 }
 0x1ba   :  { %864 = vrot.lane.b32.xlu0 %v852_v5, %s3395_s18  ;;  %v853_v45 = vmax.f32 %v635_v40, 0.0 }
 0x1cb   :  { %v845_v27 = vpop.f32.mrf.mxu0 }
 0x1cc   :  { %v846_v46 = vadd.f32 %v845_v27, %v489_v42 }
 0x1cd   :  { %v847_v44 = vpop.f32.mrf.mxu0 }
 0x1ce   :  { %v858_v48 = vmax.f32 %v846_v46, 0.0  ;;  %v848_v49 = vadd.f32 %v847_v44, %v489_v42 }
 0x1d0   :  { %v859_v15 = vmax.f32 %v848_v49, 0.0  ;;  %876 = vrot.lane.b32.xlu0 %v858_v48, %s3395_s18 }
 0x1d2   :  { %878 = vrot.lane.b32.xlu1 %v859_v15, %s3395_s18 }
 0x1d4   :  { %866 = vrot.lane.b32.xlu0 %v853_v45, %s3395_s18 }
 0x1d7   :  { %v774_v54 = vpop.f32.mrf.mxu1 }
 0x1d8   :  { %870 = vrot.lane.b32.xlu0 %v855_v50, %s3395_s18  ;;  %v775_v59 = vadd.f32 %v774_v54, %v489_v42 }
 0x1d9   :  { %v776_v56 = vpop.f32.mrf.mxu1 }
 0x1da   :  { %v777_v3 = vadd.f32 %v776_v56, %v489_v42  ;;  %v856_v19 = vmax.f32 %v775_v59, 0.0  ;;  %v4048_v42 = vshrl.u32 %v74_v11, 7 }
 0x1db   :  { %v861_v58 = vpop.permute.xlu1 %860 }
 0x1dc   :  { %v857_v9 = vmax.f32 %v777_v3, 0.0  ;;  %v954_v36 = vsub.s32 2, %v4048_v42  ;;  %v962_v27 = vsub.s32 4, %v4048_v42  ;;  %v970_v40 = vsub.s32 6, %v4048_v42 }
 0x1dd   :  { %v950_v59 = vsub.s32 1, %v4048_v42 }
 0x1de   :  { %874 = vrot.lane.b32.xlu1 %v857_v9, %s3395_s18  ;;  %v955_v20 = vrot.slane %v4054_v34, %v954_v36  ;;  %v963_v46 = vrot.slane %v4054_v34, %v962_v27  ;;  %v971_v54 = vrot.slane %v4054_v34, %v970_v40 }
 0x1df   :  { %v863_v60 = vpop.permute.xlu1 %862 }
 0x1e0   :  { %v888_v61 = vsel %vm199_vm4, %v861_v58, %v863_v60 }
 0x1e1   :  { %v4001_v57 = vmax.f32 %v851_v39, %v888_v61 }
 0x1e2   :  { %868 = vrot.lane.b32.xlu1 %v854_v37, %s3395_s18 }
 0x1e6   :  { %872 = vrot.lane.b32.xlu1 %v856_v19, %s3395_s18  ;;  %s3402_s18 = smov 62  }
 0x1ea   :  { %902 = vrot.lane.b32.xlu1 %v4001_v57, %s3398_s22 }
 0x22c   :  { %v865_v0 = vpop.permute.xlu0 %864 }
 0x22d   :  { %v887_v62 = vsel %vm199_vm4, %v863_v60, %v865_v0 }
 0x22e   :  { %v892_v18 = vmax.f32 %v852_v5, %v887_v62 }
 0x242   :  { %v877_v1 = vpop.permute.xlu0 %876 }
 0x244   :  { %v879_v41 = vpop.permute.xlu1 %878 }
 0x245   :  { %v880_v10 = vsel %vm199_vm4, %v877_v1, %v879_v41  ;;  %v889_v16 = vsel %vm199_vm4, %v879_v41, %v861_v58 }
 0x246   :  { %v4009_v17 = vmax.f32 %v850_v38, %v889_v16  ;;  %v4011_v24 = vmax.f32 %v859_v15, %v880_v10  ;;  %v867_v47 = vpop.permute.xlu0 %866 }
 0x247   :  { %v886_v8 = vsel %vm199_vm4, %v865_v0, %v867_v47  ;;  %v946_v0 = vsub.s32 0, %v4048_v42 }
 0x248   :  { %900 = vrot.lane.b32.xlu0 %v4009_v17, %s3398_s22  ;;  %918 = vrot.lane.b32.xlu1 %v4011_v24, %s3398_s22  ;;  %v4036_v25 = vmax.f32 %v853_v45, %v886_v8  ;;  %v966_v45 = vsub.s32 5, %v4048_v42 }
 0x249   :  { %v947_v10 = vrot.slane %v4054_v34, %v946_v0 }
 0x24a   :  { %v871_v13 = vpop.permute.xlu0 %870  ;;  %v967_v51 = vrot.slane %v4054_v34, %v966_v45 }
 0x24c   :  { %904 = vrot.lane.b32.xlu0 %v892_v18, %s3398_s22 }
 0x250   :  { %v875_v21 = vpop.permute.xlu1 %874 }
 0x251   :  { %v881_v23 = vsel %vm199_vm4, %v875_v21, %v877_v1 }
 0x252   :  { %v4022_v26 = vmax.f32 %v858_v48, %v881_v23 }
 0x254   :  { %916 = vrot.lane.b32.xlu0 %v4022_v26, %s3398_s22  ;;  %v869_v52 = vpop.permute.xlu1 %868 }
 0x255   :  { %v884_v30 = vsel %vm199_vm4, %v869_v52, %v871_v13  ;;  %v885_v28 = vsel %vm199_vm4, %v867_v47, %v869_v52 }
 0x256   :  { %v894_v29 = vmax.f32 %v854_v37, %v885_v28  ;;  %v895_v22 = vmax.f32 %v855_v50, %v884_v30 }
 0x258   :  { %908 = vrot.lane.b32.xlu1 %v894_v29, %s3398_s22  ;;  %910 = vrot.lane.b32.xlu0 %v895_v22, %s3398_s22  ;;  %v873_v14 = vpop.permute.xlu1 %872 }
 0x259   :  { %v883_v32 = vsel %vm199_vm4, %v871_v13, %v873_v14  ;;  %v882_v6 = vsel %vm199_vm4, %v873_v14, %v875_v21 }
 0x25a   :  { %v896_v33 = vmax.f32 %v856_v19, %v883_v32  ;;  %v4043_v2 = vmax.f32 %v857_v9, %v882_v6  ;;  %v951_v19 = vrot.slane %v4054_v34, %v950_v59  ;;  %v974_v32 = vsub.s32 7, %v4048_v42 }
 0x25c   :  { %906 = vrot.lane.b32.xlu0 %v4036_v25, %s3398_s22  ;;  %912 = vrot.lane.b32.xlu1 %v896_v33, %s3398_s22  ;;  %v903_v38 = vpop.permute.xlu1 %902 }
 0x260   :  { %914 = vrot.lane.b32.xlu1 %v4043_v2, %s3398_s22  ;;  %s3404_s22 = smov 66  }
 0x2ba   :  { %v901_v53 = vpop.permute.xlu0 %900  ;;  %v919_v5 = vpop.permute.xlu1 %918 }
 0x2bb   :  { %v928_v60 = vsel %vm117_vm6, %v901_v53, %v903_v38  ;;  %v929_v1 = vsel %vm117_vm6, %v919_v5, %v901_v53 }
 0x2bc   :  { %v931_v61 = vmax.f32 %v4001_v57, %v928_v60  ;;  %v930_v16 = vmax.f32 %v4009_v17, %v929_v1  ;;  %v941_v17 = vld [vmem:[%s5774_s5 + $0x8] sm:$0x3] }
 0x2be   :  { %v4057_v39 = vpop.permute.xlu0 %904  ;;  %v4123_v41 = vmul.f32 %v951_v19, %v931_v61  ;;  %v4131_v57 = vmul.f32 %v947_v10, %v930_v16 }
 0x2bf   :  { %v927_v35 = vsel %vm117_vm6, %v903_v38, %v4057_v39 }
 0x2c0   :  { %v932_v63 = vmax.f32 %v892_v18, %v927_v35  ;;  %v983_v18 = vrot.slane %v941_v17, %v950_v59 }
 0x2c2   :  { %v4062_v11 = vmul.f32 %v955_v20, %v932_v63 }
 0x2c4   :  { %1049 = vrot.lane.b32.xlu0 %v4062_v11, %s3401_s17  ;;  %1090 = vrot.lane.b32.xlu1 %v4062_v11, %s3402_s18 }
 0x2c6   :  { %v4068_v7 = vpop.permute.xlu0 %916 }
 0x2c7   :  { %v920_v62 = vsel %vm117_vm6, %v4068_v7, %v919_v5 }
 0x2c8   :  { %1182 = vrot.lane.b32.xlu0 %v4062_v11, %s3403_s21  ;;  %1008 = vrot.lane.b32.xlu1 %v4062_v11, %s3404_s22  ;;  %v939_v47 = vmax.f32 %v4011_v24, %v920_v62  ;;  %v958_v24 = vsub.s32 3, %v4048_v42  ;;  %v1342_v42 = vld [vmem:[%s5775_s4 + $0x8] sm:$0xff] }
 0x2ca   :  { %v911_v55 = vpop.permute.xlu0 %910  ;;  %v909_v43 = vpop.permute.xlu1 %908  ;;  %v4156_v21 = vmul.f32 %v983_v18, %v939_v47  ;;  %v959_v13 = vrot.slane %v4054_v34, %v958_v24  ;;  %v4334_v24 = vld [vmem:[%s5776_s3] sm:$0xff] }
 0x2cb   :  { %v924_v3 = vsel %vm117_vm6, %v909_v43, %v911_v55 }
 0x2cc   :  { %v935_v9 = vmax.f32 %v895_v22, %v924_v3  ;;  %v979_v22 = vrot.slane %v941_v17, %v946_v0 }
 0x2ce   :  { %v907_v44 = vpop.permute.xlu0 %906  ;;  %v4077_v48 = vpop.permute.xlu1 %912  ;;  %v4101_v37 = vmul.f32 %v967_v51, %v935_v9 }
 0x2cf   :  { %v925_v49 = vsel %vm117_vm6, %v907_v44, %v909_v43  ;;  %v923_v15 = vsel %vm117_vm6, %v911_v55, %v4077_v48  ;;  %v926_v23 = vsel %vm117_vm6, %v4057_v39, %v907_v44 }
 0x2d0   :  { %v934_v31 = vmax.f32 %v894_v29, %v925_v49  ;;  %v936_v56 = vmax.f32 %v896_v33, %v923_v15  ;;  %v933_v52 = vmax.f32 %v4036_v25, %v926_v23  ;;  %v975_v25 = vrot.slane %v4054_v34, %v974_v32 }
 0x2d2   :  { %v4085_v50 = vmul.f32 %v963_v46, %v934_v31  ;;  %v4095_v58 = vmul.f32 %v971_v54, %v936_v56  ;;  %v915_v30 = vpop.permute.xlu1 %914  ;;  %v4180_v28 = vmul.f32 %v959_v13, %v933_v52 }
 0x2d3   :  { %v921_v29 = vsel %vm117_vm6, %v915_v30, %v4068_v7 }
 0x2d4   :  { %1053 = vrot.lane.b32.xlu1 %v4085_v50, %s3401_s17  ;;  %1094 = vrot.lane.b32.xlu0 %v4085_v50, %s3402_s18  ;;  %v938_v8 = vmax.f32 %v4022_v26, %v921_v29  ;;  %v922_v26 = vsel %vm117_vm6, %v4077_v48, %v915_v30 }
 0x2d5   :  { %v937_v33 = vmax.f32 %v4043_v2, %v922_v26  ;;  %v1341_v2 = vld [vmem:[%s5775_s4] sm:$0xff] }
 0x2d6   :  { %v4194_v14 = vmul.f32 %v979_v22, %v938_v8  ;;  %v4367_v8 = vld [vmem:[%s5776_s3 + $0x8] sm:$0xff] }
 0x2d7   :  { %v4214_v6 = vmul.f32 %v975_v25, %v937_v33 }
 0x2d8   :  { %1012 = vrot.lane.b32.xlu0 %v4085_v50, %s3404_s22  ;;  %1098 = vrot.lane.b32.xlu1 %v4095_v58, %s3402_s18 }
 0x2dc   :  { %1096 = vrot.lane.b32.xlu0 %v4101_v37, %s3402_s18  ;;  %1055 = vrot.lane.b32.xlu1 %v4101_v37, %s3401_s17 }
 0x2e0   :  { %1057 = vrot.lane.b32.xlu0 %v4095_v58, %s3401_s17  ;;  %1016 = vrot.lane.b32.xlu1 %v4095_v58, %s3404_s22 }
 0x2e4   :  { %1014 = vrot.lane.b32.xlu0 %v4101_v37, %s3404_s22  ;;  %1188 = vrot.lane.b32.xlu1 %v4101_v37, %s3403_s21 }
 0x2e8   :  { %1088 = vrot.lane.b32.xlu0 %v4123_v41, %s3402_s18  ;;  %1047 = vrot.lane.b32.xlu1 %v4123_v41, %s3401_s17 }
 0x2ec   :  { %1086 = vrot.lane.b32.xlu0 %v4131_v57, %s3402_s18  ;;  %1045 = vrot.lane.b32.xlu1 %v4131_v57, %s3401_s17 }
 0x2f0   :  { %1006 = vrot.lane.b32.xlu0 %v4123_v41, %s3404_s22  ;;  %1180 = vrot.lane.b32.xlu1 %v4123_v41, %s3403_s21 }
 0x2f4   :  { %1004 = vrot.lane.b32.xlu0 %v4131_v57, %s3404_s22  ;;  %1178 = vrot.lane.b32.xlu1 %v4131_v57, %s3403_s21 }
 0x2f8   :  { %1127 = vrot.lane.b32.xlu0 %v4131_v57, %s3405_s28  ;;  %1129 = vrot.lane.b32.xlu1 %v4123_v41, %s3405_s28 }
 0x2fc   :  { %1145 = vrot.lane.b32.xlu0 %v4156_v21, %s3405_s28  ;;  %1104 = vrot.lane.b32.xlu1 %v4156_v21, %s3402_s18 }
 0x300   :  { %1063 = vrot.lane.b32.xlu0 %v4156_v21, %s3401_s17  ;;  %1022 = vrot.lane.b32.xlu1 %v4156_v21, %s3404_s22 }
 0x304   :  { %1190 = vrot.lane.b32.xlu0 %v4095_v58, %s3403_s21  ;;  %1186 = vrot.lane.b32.xlu1 %v4085_v50, %s3403_s21 }
 0x308   :  { %1135 = vrot.lane.b32.xlu0 %v4085_v50, %s3405_s28  ;;  %1137 = vrot.lane.b32.xlu1 %v4101_v37, %s3405_s28 }
 0x30c   :  { %1133 = vrot.lane.b32.xlu0 %v4180_v28, %s3405_s28  ;;  %1092 = vrot.lane.b32.xlu1 %v4180_v28, %s3402_s18 }
 0x310   :  { %1051 = vrot.lane.b32.xlu0 %v4180_v28, %s3401_s17  ;;  %1010 = vrot.lane.b32.xlu1 %v4180_v28, %s3404_s22 }
 0x314   :  { %1061 = vrot.lane.b32.xlu1 %v4194_v14, %s3401_s17  ;;  %1102 = vrot.lane.b32.xlu0 %v4194_v14, %s3402_s18 }
 0x318   :  { %1196 = vrot.lane.b32.xlu1 %v4156_v21, %s3403_s21  ;;  %1020 = vrot.lane.b32.xlu0 %v4194_v14, %s3404_s22 }
 0x31c   :  { %1143 = vrot.lane.b32.xlu1 %v4194_v14, %s3405_s28  ;;  %1194 = vrot.lane.b32.xlu0 %v4194_v14, %s3403_s21 }
 0x320   :  { %1100 = vrot.lane.b32.xlu1 %v4214_v6, %s3402_s18  ;;  %1141 = vrot.lane.b32.xlu0 %v4214_v6, %s3405_s28 }
 0x324   :  { %1018 = vrot.lane.b32.xlu1 %v4214_v6, %s3404_s22  ;;  %1059 = vrot.lane.b32.xlu0 %v4214_v6, %s3401_s17 }
 0x328   :  { %1131 = vrot.lane.b32.xlu1 %v4062_v11, %s3405_s28  ;;  %1184 = vrot.lane.b32.xlu0 %v4180_v28, %s3403_s21 }
 0x32c   :  { %1139 = vrot.lane.b32.xlu1 %v4095_v58, %s3405_s28  ;;  %1192 = vrot.lane.b32.xlu0 %v4214_v6, %s3403_s21 }
 0x330   :  { %1345 = vperm.xlu0 %3299, %v1341_v2   ;;  %1350 = vperm.xlu1 %3300, %v1342_v42  }
 0x336   :  { %v4238_v53 = vpop.permute.xlu0 %1049  ;;  %v4240_v36 = vpop.permute.xlu1 %1090 }
 0x33a   :  { %v4242_v34 = vpop.permute.xlu0 %1182  ;;  %v4244_v38 = vpop.permute.xlu1 %1008 }
 0x346   :  { %v4246_v20 = vpop.permute.xlu0 %1094  ;;  %v4248_v39 = vpop.permute.xlu1 %1053 }
 0x34a   :  { %v4250_v35 = vpop.permute.xlu0 %1012  ;;  %v4252_v63 = vpop.permute.xlu1 %1098 }
 0x34e   :  { %v1097_v5 = vpop.permute.xlu0 %1096  ;;  %v4254_v7 = vpop.permute.xlu1 %1055 }
 0x34f   :  { %v4349_v30 = vsel %vm1106_vm9, %v1097_v5, %v4252_v63  ;;  %v1111_v29 = vsel %vm1106_vm9, %v4246_v20, %v1097_v5  ;;  %v1070_v32 = vsel %vm1065_vm10, %v4248_v39, %v4254_v7 }
 0x352   :  { %v4256_v55 = vpop.permute.xlu0 %1057  ;;  %v4258_v43 = vpop.permute.xlu1 %1016 }
 0x353   :  { %v4361_v22 = vsel %vm1065_vm10, %v4254_v7, %v4256_v55 }
 0x356   :  { %v4260_v27 = vpop.permute.xlu0 %1014  ;;  %v4262_v46 = vpop.permute.xlu1 %1188 }
 0x357   :  { %v4380_v33 = vsel %vm1024_vm11, %v4260_v27, %v4258_v43  ;;  %v1029_v2 = vsel %vm1024_vm11, %v4250_v35, %v4260_v27 }
 0x35a   :  { %v1089_v44 = vpop.permute.xlu0 %1088  ;;  %v1048_v40 = vpop.permute.xlu1 %1047 }
 0x35b   :  { %v4268_v48 = vsel %vm1106_vm9, %v1089_v44, %v4240_v36  ;;  %v4277_v45 = vsel %vm1065_vm10, %v1048_v40, %v4238_v53 }
 0x35c   :  { %1373 = vmatprep.subr.mxu1 %v4268_v48 }
 0x35e   :  { %v1087_v49 = vpop.permute.xlu0 %1086  ;;  %v1046_v15 = vpop.permute.xlu1 %1045 }
 0x35f   :  { %v1115_v31 = vsel %vm1106_vm9, %v1087_v49, %v1089_v44  ;;  %v1074_v54 = vsel %vm1065_vm10, %v1046_v15, %v1048_v40 }
 0x360   :  { %1374 = vmatpush1.msra.mxu1 %v1115_v31 }
 0x361   :  { %1375 = vmatprep.subr.mxu1 %v4277_v45 }
 0x362   :  { %v1007_v56 = vpop.permute.xlu0 %1006  ;;  %1376 = vmatpush1.msra.mxu1 %v1074_v54  ;;  %v1181_v3 = vpop.permute.xlu1 %1180 }
 0x363   :  { %v4286_v51 = vsel %vm1024_vm11, %v1007_v56, %v4244_v38  ;;  %v1206_v19 = vsel %vm1198_vm12, %v1181_v3, %v4242_v34 }
 0x364   :  { %1377 = vmatprep.subr.mxu1 %v4286_v51 }
 0x366   :  { %v1005_v9 = vpop.permute.xlu0 %1004  ;;  %v4290_v59 = vpop.permute.xlu1 %1178 }
 0x367   :  { %v1033_v60 = vsel %vm1024_vm11, %v1005_v9, %v1007_v56  ;;  %v1207_v61 = vsel %vm1198_vm12, %v4290_v59, %v1181_v3 }
 0x368   :  { %1378 = vmatpush1.msra.mxu1 %v1033_v60 }
 0x369   :  { %1379 = vmatprep.subr.mxu1 %v1206_v19 }
 0x36a   :  { %v1128_v0 = vpop.permute.xlu0 %1127  ;;  %1380 = vmatpush1.msra.mxu1 %v1207_v61  ;;  %v4301_v1 = vpop.permute.xlu1 %1129 }
 0x36b   :  { %1381 = vmatprep.subr.mxu1 %v4123_v41  ;;  %v1156_v10 = vsel %vm1147_vm13, %v1128_v0, %v4301_v1 }
 0x36c   :  { %1382 = vmatpush1.msra.mxu1 %v4131_v57 }
 0x36d   :  { %1383 = vmatprep.subr.mxu1 %v1156_v10 }
 0x36e   :  { %v4308_v16 = vpop.permute.xlu0 %1145  ;;  %v4310_v17 = vpop.permute.xlu1 %1104 }
 0x36f   :  { %v1157_v62 = vsel %vm1147_vm13, %v4308_v16, %v1128_v0  ;;  %v4318_v41 = vsel %vm1106_vm9, %v4310_v17, %v1087_v49 }
 0x370   :  { %1384 = vmatpush1.msra.mxu1 %v1157_v62 }
 0x371   :  { %1385 = vmatprep.subr.mxu1 %v1115_v31 }
 0x372   :  { %v4320_v18 = vpop.permute.xlu0 %1063  ;;  %1386 = vmatpush1.msra.mxu1 %v4318_v41  ;;  %v4323_v57 = vpop.permute.xlu1 %1022 }
 0x373   :  { %v4328_v47 = vsel %vm1065_vm10, %v4320_v18, %v1046_v15  ;;  %1387 = vmatprep.subr.mxu1 %v1074_v54  ;;  %v4339_v23 = vsel %vm1024_vm11, %v4323_v57, %v1005_v9 }
 0x374   :  { %1388 = vmatpush1.msra.mxu1 %v4328_v47 }
 0x375   :  { %1389 = vmatprep.subr.mxu1 %v1033_v60 }
 0x376   :  { %v4341_v13 = vpop.permute.xlu0 %1190  ;;  %1390 = vmatpush1.msra.mxu1 %v4339_v23  ;;  %v4344_v52 = vpop.permute.xlu1 %1186 }
 0x377   :  { %2980 = vmatmul.mubr.msk.f32.vlgmr.msra.gmra.mxu1 %vm491_vm8, %v4334_v24  ;;  %1527 = vmatprep.subr.mxu1 %v4349_v30  ;;  %v1202_v42 = vsel %vm1198_vm12, %v4262_v46, %v4341_v13  ;;  %v1203_v5 = vsel %vm1198_vm12, %v4344_v52, %v4262_v46 }
 0x378   :  { %1528 = vmatpush1.msra.mxu1 %v1111_v29  ;;  %1429 = vmatprep.mubr.f32.mxu1 %v3397_v4 }
 0x379   :  { %1529 = vmatprep.subr.mxu1 %v4361_v22 }
 0x37a   :  { %v1136_v26 = vpop.permute.xlu0 %1135  ;;  %1530 = vmatpush1.msra.mxu1 %v1070_v32  ;;  %v4374_v25 = vpop.permute.xlu1 %1137 }
 0x37b   :  { %2981 = vmatmul.mubr.msk.f32.gmra.mxu1 %vm491_vm8, %v4367_v8  ;;  %1531 = vmatprep.subr.mxu1 %v4380_v33  ;;  %v1152_v46 = vsel %vm1147_vm13, %v1136_v26, %v4374_v25 }
 0x37c   :  { %1532 = vmatpush1.msra.mxu1 %v1029_v2  ;;  %1577 = vmatprep.mubr.f32.mxu1 %v3397_v4 }
 0x37d   :  { %1533 = vmatprep.subr.mxu1 %v1202_v42 }
 0x37e   :  { %v4398_v7 = vpop.permute.xlu0 %1133  ;;  %1534 = vmatpush1.msra.mxu1 %v1203_v5  ;;  %v1093_v27 = vpop.permute.xlu1 %1092 }
 0x37f   :  { %v4403_v44 = vsel %vm1106_vm9, %v4240_v36, %v1093_v27  ;;  %1535 = vmatprep.subr.mxu1 %v4101_v37  ;;  %v1112_v40 = vsel %vm1106_vm9, %v1093_v27, %v4246_v20  ;;  %v1153_v49 = vsel %vm1147_vm13, %v4398_v7, %v1136_v26 }
 0x380   :  { %1450 = vmatprep.subr.mxu0 %v1112_v40  ;;  %1536 = vmatpush1.msra.mxu1 %v4085_v50 }
 0x381   :  { %1451 = vmatpush1.msra.mxu0 %v4403_v44  ;;  %1537 = vmatprep.subr.mxu1 %v1152_v46 }
 0x382   :  { %v1052_v36 = vpop.permute.xlu0 %1051  ;;  %1538 = vmatpush1.msra.mxu1 %v1153_v49  ;;  %v1011_v37 = vpop.permute.xlu1 %1010 }
 0x383   :  { %v4420_v20 = vsel %vm1065_vm10, %v4238_v53, %v1052_v36  ;;  %1539 = vmatprep.subr.mxu1 %v1111_v29  ;;  %v1071_v50 = vsel %vm1065_vm10, %v1052_v36, %v4248_v39  ;;  %v1030_v15 = vsel %vm1024_vm11, %v1011_v37, %v4250_v35  ;;  %v4432_v31 = vsel %vm1024_vm11, %v4244_v38, %v1011_v37 }
 0x384   :  { %1452 = vmatprep.subr.mxu0 %v1071_v50  ;;  %1540 = vmatpush1.msra.mxu1 %v1112_v40 }
 0x385   :  { %1453 = vmatpush1.msra.mxu0 %v4420_v20  ;;  %1541 = vmatprep.subr.mxu1 %v1070_v32 }
 0x386   :  { %v1103_v53 = vpop.permute.xlu0 %1102  ;;  %1454 = vmatprep.subr.mxu0 %v1030_v15  ;;  %1542 = vmatpush1.msra.mxu1 %v1071_v50  ;;  %v1062_v54 = vpop.permute.xlu1 %1061 }
 0x387   :  { %1455 = vmatpush1.msra.mxu0 %v4432_v31  ;;  %1543 = vmatprep.subr.mxu1 %v1029_v2  ;;  %v1107_v39 = vsel %vm1106_vm9, %v1103_v53, %v4310_v17  ;;  %v1066_v56 = vsel %vm1065_vm10, %v1062_v54, %v4320_v18 }
 0x388   :  { %1544 = vmatpush1.msra.mxu1 %v1030_v15 }
 0x389   :  { %2984 = vmatmul.mubr.msk.f32.vlgmr.msra.gmra.mxu1 %vm491_vm8, %v4334_v24  ;;  %1681 = vmatprep.subr.mxu1 %v4318_v41 }
 0x38a   :  { %v1021_v35 = vpop.permute.xlu0 %1020  ;;  %1682 = vmatpush1.msra.mxu1 %v1107_v39  ;;  %v1197_v38 = vpop.permute.xlu1 %1196  ;;  %1583 = vmatprep.mubr.f32.mxu1 %v3397_v4 }
 0x38b   :  { %1683 = vmatprep.subr.mxu1 %v4328_v47  ;;  %v1025_v3 = vsel %vm1024_vm11, %v1021_v35, %v4323_v57  ;;  %v1208_v19 = vsel %vm1198_vm12, %v1197_v38, %v4290_v59 }
 0x38c   :  { %1684 = vmatpush1.msra.mxu1 %v1066_v56 }
 0x38d   :  { %1685 = vmatprep.subr.mxu1 %v4339_v23  ;;  %2985 = vmatmul.mubr.msk.f32.gmra.mxu1 %vm491_vm8, %v4367_v8 }
 0x38e   :  { %v1195_v9 = vpop.permute.xlu0 %1194  ;;  %1686 = vmatpush1.msra.mxu1 %v1025_v3  ;;  %v1144_v60 = vpop.permute.xlu1 %1143  ;;  %1731 = vmatprep.mubr.f32.mxu1 %v3397_v4 }
 0x38f   :  { %v1199_v61 = vsel %vm1198_vm12, %v1195_v9, %v1197_v38  ;;  %1687 = vmatprep.subr.mxu1 %v1208_v19  ;;  %v1148_v17 = vsel %vm1147_vm13, %v1144_v60, %v4308_v16 }
 0x390   :  { %1688 = vmatpush1.msra.mxu1 %v1199_v61 }
 0x391   :  { %1689 = vmatprep.subr.mxu1 %v4156_v21 }
 0x392   :  { %v1142_v0 = vpop.permute.xlu0 %1141  ;;  %1690 = vmatpush1.msra.mxu1 %v4194_v14  ;;  %v1101_v10 = vpop.permute.xlu1 %1100 }
 0x393   :  { %v1149_v59 = vsel %vm1147_vm13, %v1142_v0, %v1144_v60  ;;  %1691 = vmatprep.subr.mxu1 %v1148_v17  ;;  %v1108_v62 = vsel %vm1106_vm9, %v1101_v10, %v1103_v53 }
 0x394   :  { %1692 = vmatpush1.msra.mxu1 %v1149_v59 }
 0x395   :  { %1693 = vmatprep.subr.mxu1 %v1107_v39 }
 0x396   :  { %v1060_v41 = vpop.permute.xlu0 %1059  ;;  %1694 = vmatpush1.msra.mxu1 %v1108_v62  ;;  %v1019_v21 = vpop.permute.xlu1 %1018 }
 0x397   :  { %v1067_v14 = vsel %vm1065_vm10, %v1060_v41, %v1062_v54  ;;  %1695 = vmatprep.subr.mxu1 %v1066_v56  ;;  %v1026_v16 = vsel %vm1024_vm11, %v1019_v21, %v1021_v35 }
 0x398   :  { %1696 = vmatpush1.msra.mxu1 %v1067_v14 }
 0x399   :  { %1697 = vmatprep.subr.mxu1 %v1025_v3 }
 0x39a   :  { %v1185_v18 = vpop.permute.xlu0 %1184  ;;  %1698 = vmatpush1.msra.mxu1 %v1026_v16  ;;  %v1132_v23 = vpop.permute.xlu1 %1131 }
 0x39b   :  { %v1205_v57 = vsel %vm1198_vm12, %v4242_v34, %v1185_v18  ;;  %2988 = vmatmul.mubr.msk.f32.vlgmr.msra.gmra.mxu1 %vm491_vm8, %v4334_v24  ;;  %v1204_v47 = vsel %vm1198_vm12, %v1185_v18, %v4344_v52  ;;  %v1154_v34 = vsel %vm1147_vm13, %v1132_v23, %v4398_v7  ;;  %v1155_v52 = vsel %vm1147_vm13, %v4301_v1, %v1132_v23 }
 0x39c   :  { %1456 = vmatprep.subr.mxu0 %v1204_v47  ;;  %1737 = vmatprep.mubr.f32.mxu1 %v3397_v4 }
 0x39d   :  { %1457 = vmatpush1.msra.mxu0 %v1205_v57 }
 0x39e   :  { %1458 = vmatprep.subr.mxu0 %v4180_v28  ;;  %v1068_v28 = vsel %vm1065_vm10, %v4256_v55, %v1060_v41 }
 0x39f   :  { %1459 = vmatpush1.msra.mxu0 %v4062_v11  ;;  %2989 = vmatmul.mubr.msk.f32.gmra.mxu1 %vm491_vm8, %v4367_v8  ;;  %v1109_v11 = vsel %vm1106_vm9, %v4252_v63, %v1101_v10 }
 0x3a0   :  { %1460 = vmatprep.subr.mxu0 %v1154_v34 }
 0x3a1   :  { %1461 = vmatpush1.msra.mxu0 %v1155_v52 }
 0x3a2   :  { %1462 = vmatprep.subr.mxu0 %v4403_v44 }
 0x3a3   :  { %1463 = vmatpush1.msra.mxu0 %v4268_v48  ;;  %v1193_v48 = vpop.permute.xlu0 %1192 }
 0x3a4   :  { %1464 = vmatprep.subr.mxu0 %v4420_v20  ;;  %v1200_v63 = vsel %vm1198_vm12, %v1193_v48, %v1195_v9  ;;  %v1201_v55 = vsel %vm1198_vm12, %v4341_v13, %v1193_v48 }
 0x3a5   :  { %1465 = vmatpush1.msra.mxu0 %v4277_v45  ;;  %v1027_v45 = vsel %vm1024_vm11, %v4258_v43, %v1019_v21 }
 0x3a6   :  { %1466 = vmatprep.subr.mxu0 %v4432_v31 }
 0x3a7   :  { %1467 = vmatpush1.msra.mxu0 %v4286_v51  ;;  %v1140_v51 = vpop.permute.xlu1 %1139 }
 0x3a8   :  { %2982 = vmatmul.mubr.msk.f32.vlgmr.msra.gmra.mxu0 %vm491_vm8, %v4334_v24  ;;  %1604 = vmatprep.subr.mxu0 %v1108_v62  ;;  %v1150_v43 = vsel %vm1147_vm13, %v1140_v51, %v1142_v0  ;;  %v1151_v1 = vsel %vm1147_vm13, %v4374_v25, %v1140_v51 }
 0x3a9   :  { %1605 = vmatpush1.msra.mxu0 %v1109_v11  ;;  %1506 = vmatprep.mubr.f32.mxu0 %v3397_v4 }
 0x3aa   :  { %1606 = vmatprep.subr.mxu0 %v1067_v14 }
 0x3ab   :  { %1607 = vmatpush1.msra.mxu0 %v1068_v28  ;;  %v4536_v29 = vpop.permute.xlu1 %1350 }
 0x3ac   :  { %2983 = vmatmul.mubr.msk.f32.gmra.mxu0 %vm491_vm8, %v4367_v8  ;;  %1608 = vmatprep.subr.mxu0 %v1026_v16 }
 0x3ad   :  { %1609 = vmatpush1.msra.mxu0 %v1027_v45  ;;  %1654 = vmatprep.mubr.f32.mxu0 %v3397_v4 }
 0x3ae   :  { %1610 = vmatprep.subr.mxu0 %v1200_v63 }
 0x3af   :  { %1611 = vmatpush1.msra.mxu0 %v1201_v55 }
 0x3b0   :  { %1612 = vmatprep.subr.mxu0 %v4214_v6 }
 0x3b1   :  { %1613 = vmatpush1.msra.mxu0 %v4095_v58  ;;  %v4531_v58 = vpop.permute.xlu0 %1345 }
 0x3b2   :  { %1614 = vmatprep.subr.mxu0 %v1150_v43 }
 0x3b3   :  { %1615 = vmatpush1.msra.mxu0 %v1151_v1 }
 0x3b4   :  { %1616 = vmatprep.subr.mxu0 %v1109_v11 }
 0x3b5   :  { %1617 = vmatpush1.msra.mxu0 %v4349_v30 }
 0x3b6   :  { %1618 = vmatprep.subr.mxu0 %v1068_v28 }
 0x3b7   :  { %1619 = vmatpush1.msra.mxu0 %v4361_v22 }
 0x3b8   :  { %1620 = vmatprep.subr.mxu0 %v1027_v45 }
 0x3b9   :  { %1621 = vmatpush1.msra.mxu0 %v4380_v33 }
 0x3ba   :  { %2986 = vmatmul.mubr.msk.f32.vlgmr.msra.gmra.mxu0 %vm491_vm8, %v4334_v24 }
 0x3bb   :  { %1660 = vmatprep.mubr.f32.mxu0 %v3397_v4 }
 0x3be   :  { %2987 = vmatmul.mubr.msk.f32.gmra.mxu0 %vm491_vm8, %v4367_v8 }
 0x437   :  { %v1425_v6 = vpop.f32.mrf.mxu1 }
 0x438   :  { %v4534_v13 = vadd.f32 %v1425_v6, %v4531_v58  ;;  %v1955_v6 = vld [vmem:[%s5777_s6 + $0xf8] sm:$0xff] }
 0x439   :  { %v1427_v30 = vpop.f32.mrf.mxu1  ;;  %2995 = vmatprep.subr.mxu0 %v1955_v6  ;;  %v1967_v6 = vld [vmem:[%s5777_s6 + $0x158] sm:$0xff] }
 0x43a   :  { %v4539_v22 = vadd.f32 %v1427_v30, %v4531_v58  ;;  %v1744_v24 = vmax.f32 %v4534_v13, 0.0  ;;  %v1939_v30 = vld [vmem:[%s5777_s6 + $0x78] sm:$0xff] }
 0x43b   :  { %v1431_v32 = vpop.f32.mrf.mxu1  ;;  %2996 = vmatpush3.msra.mxu0 %v1939_v30  ;;  %v1932_v30 = vld [vmem:[%s5777_s6 + $0x40] sm:$0xff] }
 0x43c   :  { %v1745_v26 = vmax.f32 %v4539_v22, 0.0  ;;  %v4544_v25 = vadd.f32 %v1431_v32, %v4536_v29  ;;  %v1954_v32 = vld [vmem:[%s5777_s6 + $0xf0] sm:$0xff] }
 0x43d   :  { %v1433_v8 = vpop.f32.mrf.mxu1  ;;  %2997 = vmatprep.subr.mxu0 %v1954_v32  ;;  %v1982_v32 = vld [vmem:[%s5777_s6 + $0x1d0] sm:$0xff] }
 0x43e   :  { %v3301_v33 = vpack.i.bf16 %v1745_v26, %v1744_v24  ;;  %v4551_v2 = vadd.f32 %v1433_v8, %v4536_v29  ;;  %v1754_v42 = vmax.f32 %v4544_v25, 0.0 }
 0x440   :  { %3302 = vrot.lane.b32.xlu0 %v3301_v33, %s3405_s28  ;;  %v1755_v5 = vmax.f32 %v4551_v2, 0.0 }
 0x442   :  { %v3311_v7 = vpack.i.bf16 %v1755_v5, %v1754_v42 }
 0x444   :  { %3312 = vrot.lane.b32.xlu0 %v3311_v7, %s3405_s28  ;;  %v1953_v7 = vld [vmem:[%s5777_s6 + $0xe8] sm:$0xff] }
 0x449   :  { %v1579_v27 = vpop.f32.mrf.mxu1 }
 0x44a   :  { %v4584_v3 = vadd.f32 %v1579_v27, %v4531_v58 }
 0x44b   :  { %v1581_v44 = vpop.f32.mrf.mxu1 }
 0x44c   :  { %v4573_v39 = vadd.f32 %v1581_v44, %v4531_v58  ;;  %v1748_v10 = vmax.f32 %v4584_v3, 0.0  ;;  %v1937_v44 = vld [vmem:[%s5777_s6 + $0x68] sm:$0xff] }
 0x44d   :  { %v1585_v40 = vpop.f32.mrf.mxu1 }
 0x44e   :  { %v1749_v60 = vmax.f32 %v4573_v39, 0.0  ;;  %v4590_v19 = vadd.f32 %v1585_v40, %v4536_v29  ;;  %v1952_v40 = vld [vmem:[%s5777_s6 + $0xe0] sm:$0xff] }
 0x44f   :  { %v1587_v46 = vpop.f32.mrf.mxu1 }
 0x450   :  { %v4593_v61 = vadd.f32 %v1587_v46, %v4536_v29  ;;  %v3326_v62 = vpack.i.bf16 %v1749_v60, %v1748_v10  ;;  %v1758_v41 = vmax.f32 %v4590_v19, 0.0  ;;  %v1987_v46 = vld [vmem:[%s5777_s6 + $0x1f8] sm:$0xff] }
 0x451   :  { %3033 = vmatprep.subr.mxu1 %v1987_v46  ;;  %v1945_v46 = vld [vmem:[%s5777_s6 + $0xa8] sm:$0xff] }
 0x452   :  { %v1759_v21 = vmax.f32 %v4593_v61, 0.0 }
 0x454   :  { %v3336_v34 = vpack.i.bf16 %v1759_v21, %v1758_v41 }
 0x45b   :  { %v1733_v49 = vpop.f32.mrf.mxu1 }
 0x45c   :  { %v4562_v36 = vadd.f32 %v1733_v49, %v4531_v58  ;;  %v1936_v49 = vld [vmem:[%s5777_s6 + $0x60] sm:$0xff] }
 0x45d   :  { %v1735_v37 = vpop.f32.mrf.mxu1 }
 0x45e   :  { %v4565_v20 = vadd.f32 %v1735_v37, %v4531_v58  ;;  %v1752_v15 = vmax.f32 %v4562_v36, 0.0  ;;  %v1971_v37 = vld [vmem:[%s5777_s6 + $0x178] sm:$0xff]  ;;  %v2001_v36 = vld [vmem:[%s5777_s6 + $0x268] sm:$0xff] }
 0x45f   :  { %v1739_v50 = vpop.f32.mrf.mxu1  ;;  %3034 = vmatpush3.msra.mxu1 %v1971_v37  ;;  %v1944_v37 = vld [vmem:[%s5777_s6 + $0xa0] sm:$0xff] }
 0x460   :  { %v1753_v31 = vmax.f32 %v4565_v20, 0.0  ;;  %v4570_v53 = vadd.f32 %v1739_v50, %v4536_v29  ;;  %v1951_v50 = vld [vmem:[%s5777_s6 + $0xd8] sm:$0xff] }
 0x461   :  { %v1741_v54 = vpop.f32.mrf.mxu1 }
 0x462   :  { %v3306_v35 = vpack.i.bf16 %v1752_v15, %v1753_v31  ;;  %v1762_v38 = vmax.f32 %v4570_v53, 0.0  ;;  %v4581_v56 = vadd.f32 %v1741_v54, %v4536_v29  ;;  %v1986_v54 = vld [vmem:[%s5777_s6 + $0x1f0] sm:$0xff] }
 0x463   :  { %3035 = vmatprep.subr.mxu1 %v1986_v54  ;;  %v1943_v54 = vld [vmem:[%s5777_s6 + $0x98] sm:$0xff] }
 0x464   :  { %v1763_v9 = vmax.f32 %v4581_v56, 0.0  ;;  %3307 = vrot.lane.b32.xlu1 %v3306_v35, %s3405_s28  ;;  %v1970_v35 = vld [vmem:[%s5777_s6 + $0x170] sm:$0xff] }
 0x465   :  { %3036 = vmatpush3.msra.mxu1 %v1970_v35 }
 0x466   :  { %v3321_v0 = vpack.i.bf16 %v1762_v38, %v1763_v9 }
 0x468   :  { %v1502_v17 = vpop.f32.mrf.mxu0  ;;  %3322 = vrot.lane.b32.xlu1 %v3321_v0, %s3405_s28  ;;  %v1935_v0 = vld [vmem:[%s5777_s6 + $0x58] sm:$0xff] }
 0x469   :  { %v4602_v59 = vadd.f32 %v1502_v17, %v4531_v58  ;;  %v1985_v17 = vld [vmem:[%s5777_s6 + $0x1e8] sm:$0xff] }
 0x46a   :  { %v1504_v14 = vpop.f32.mrf.mxu0  ;;  %3037 = vmatprep.subr.mxu1 %v1985_v17  ;;  %v1981_v17 = vld [vmem:[%s5777_s6 + $0x1c8] sm:$0xff] }
 0x46b   :  { %v4611_v16 = vadd.f32 %v1504_v14, %v4531_v58  ;;  %v1746_v57 = vmax.f32 %v4602_v59, 0.0  ;;  %v1969_v14 = vld [vmem:[%s5777_s6 + $0x168] sm:$0xff] }
 0x46c   :  { %v1508_v18 = vpop.f32.mrf.mxu0  ;;  %3327 = vrot.lane.b32.xlu1 %v3326_v62, %s3405_s28  ;;  %v1950_v62 = vld [vmem:[%s5777_s6 + $0xd0] sm:$0xff]  ;;  %3038 = vmatpush3.msra.mxu1 %v1969_v14  ;;  %v1965_v14 = vld [vmem:[%s5777_s6 + $0x148] sm:$0xff] }
 0x46d   :  { %v1747_v47 = vmax.f32 %v4611_v16, 0.0  ;;  %v4617_v23 = vadd.f32 %v1508_v18, %v4536_v29  ;;  %v1934_v18 = vld [vmem:[%s5777_s6 + $0x50] sm:$0xff] }
 0x46e   :  { %v1510_v52 = vpop.f32.mrf.mxu0 }
 0x46f   :  { %v3316_v11 = vpack.i.bf16 %v1747_v47, %v1746_v57  ;;  %v1756_v28 = vmax.f32 %v4617_v23, 0.0  ;;  %v4629_v48 = vadd.f32 %v1510_v52, %v4536_v29  ;;  %v1949_v52 = vld [vmem:[%s5777_s6 + $0xc8] sm:$0xff] }
 0x470   :  { %3337 = vrot.lane.b32.xlu1 %v3336_v34, %s3405_s28  ;;  %v1984_v34 = vld [vmem:[%s5777_s6 + $0x1e0] sm:$0xff] }
 0x471   :  { %v1757_v45 = vmax.f32 %v4629_v48, 0.0  ;;  %3317 = vrot.lane.b32.xlu0 %v3316_v11, %s3405_s28  ;;  %v1968_v11 = vld [vmem:[%s5777_s6 + $0x160] sm:$0xff]  ;;  %3039 = vmatprep.subr.mxu1 %v1984_v34  ;;  %v1926_v34 = vld [vmem:[%s5777_s6 + $0x10] sm:$0xff] }
 0x472   :  { %3040 = vmatpush3.msra.mxu1 %v1968_v11 }
 0x473   :  { %v3331_v63 = vpack.i.bf16 %v1757_v45, %v1756_v28 }
 0x475   :  { %3332 = vrot.lane.b32.xlu0 %v3331_v63, %s3405_s28  ;;  %v1933_v63 = vld [vmem:[%s5777_s6 + $0x48] sm:$0xff] }
 0x47a   :  { %v1656_v55 = vpop.f32.mrf.mxu0 }
 0x47b   :  { %v4640_v51 = vadd.f32 %v1656_v55, %v4531_v58  ;;  %v1983_v55 = vld [vmem:[%s5777_s6 + $0x1d8] sm:$0xff] }
 0x47c   :  { %v1658_v43 = vpop.f32.mrf.mxu0  ;;  %3041 = vmatprep.subr.mxu1 %v1983_v55  ;;  %v1941_v55 = vld [vmem:[%s5777_s6 + $0x88] sm:$0xff] }
 0x47d   :  { %v4643_v1 = vadd.f32 %v1658_v43, %v4531_v58  ;;  %v1750_v8 = vmax.f32 %v4640_v51, 0.0  ;;  %v1938_v58 = vld [vmem:[%s5777_s6 + $0x70] sm:$0xff]  ;;  %v1948_v43 = vld [vmem:[%s5777_s6 + $0xc0] sm:$0xff]  ;;  %3042 = vmatpush3.msra.mxu1 %v1967_v6  ;;  %v1925_v6 = vld [vmem:[%s5777_s6 + $0x8] sm:$0xff] }
 0x47e   :  { %2998 = vmatpush3.msra.mxu0 %v1938_v58  ;;  %v1947_v58 = vld [vmem:[%s5777_s6 + $0xb8] sm:$0xff]  ;;  %3043 = vmatprep.subr.mxu1 %v1982_v32 }
 0x47f   :  { %v1751_v33 = vmax.f32 %v4643_v1, 0.0  ;;  %2999 = vmatprep.subr.mxu0 %v1953_v7  ;;  %v1966_v7 = vld [vmem:[%s5777_s6 + $0x150] sm:$0xff] }
 0x480   :  { %3000 = vmatpush3.msra.mxu0 %v1937_v44  ;;  %v1946_v44 = vld [vmem:[%s5777_s6 + $0xb0] sm:$0xff]  ;;  %3044 = vmatpush3.msra.mxu1 %v1966_v7  ;;  %v1963_v7 = vld [vmem:[%s5777_s6 + $0x138] sm:$0xff] }
 0x481   :  { %v3341_v27 = vpack.i.bf16 %v1751_v33, %v1750_v8  ;;  %3001 = vmatprep.subr.mxu0 %v1952_v40  ;;  %v1930_v40 = vld [vmem:[%s5777_s6 + $0x30] sm:$0xff]  ;;  %3045 = vmatprep.subr.mxu1 %v1981_v17 }
 0x482   :  { %3002 = vmatpush3.msra.mxu0 %v1936_v49  ;;  %v1929_v49 = vld [vmem:[%s5777_s6 + $0x28] sm:$0xff]  ;;  %3046 = vmatpush3.msra.mxu1 %v1965_v14 }
 0x483   :  { %3342 = vrot.lane.b32.xlu0 %v3341_v27, %s3405_s28  ;;  %3003 = vmatprep.subr.mxu0 %v1951_v50  ;;  %v1931_v27 = vld [vmem:[%s5777_s6 + $0x38] sm:$0xff]  ;;  %v1928_v50 = vld [vmem:[%s5777_s6 + $0x20] sm:$0xff]  ;;  %v1977_v14 = vld [vmem:[%s5777_s6 + $0x1a8] sm:$0xff] }
 0x484   :  { %3004 = vmatpush3.msra.mxu0 %v1935_v0  ;;  %v1927_v0 = vld [vmem:[%s5777_s6 + $0x18] sm:$0xff] }
 0x485   :  { %3005 = vmatprep.subr.mxu0 %v1950_v62  ;;  %v1942_v62 = vld [vmem:[%s5777_s6 + $0x90] sm:$0xff] }
 0x486   :  { %3006 = vmatpush3.msra.mxu0 %v1934_v18  ;;  %v1662_v18 = vpop.f32.mrf.mxu0 }
 0x487   :  { %3007 = vmatprep.subr.mxu0 %v1949_v52  ;;  %v1980_v52 = vld [vmem:[%s5777_s6 + $0x1c0] sm:$0xff] }
 0x488   :  { %3008 = vmatpush3.msra.mxu0 %v1933_v63  ;;  %3047 = vmatprep.subr.mxu1 %v1980_v52 }
 0x489   :  { %3009 = vmatprep.subr.mxu0 %v1948_v43  ;;  %v1964_v43 = vld [vmem:[%s5777_s6 + $0x140] sm:$0xff] }
 0x48a   :  { %3010 = vmatpush3.msra.mxu0 %v1932_v30  ;;  %3048 = vmatpush3.msra.mxu1 %v1964_v43  ;;  %v1979_v30 = vld [vmem:[%s5777_s6 + $0x1b8] sm:$0xff] }
 0x48b   :  { %3011 = vmatprep.subr.mxu0 %v1947_v58  ;;  %3049 = vmatprep.subr.mxu1 %v1979_v30  ;;  %v1940_v58 = vld [vmem:[%s5777_s6 + $0x80] sm:$0xff] }
 0x48c   :  { %3012 = vmatpush3.msra.mxu0 %v1931_v27  ;;  %v1664_v27 = vpop.f32.mrf.mxu0  ;;  %3050 = vmatpush3.msra.mxu1 %v1963_v7 }
 0x48d   :  { %3013 = vmatprep.subr.mxu0 %v1946_v44  ;;  %v1924_v44 = vld [vmem:[%s5777_s6] sm:$0xff]  ;;  %v4834_v52 = vadd.f32 %v1664_v27, %v4536_v29  ;;  %v1959_v27 = vld [vmem:[%s5777_s6 + $0x118] sm:$0xff] }
 0x48e   :  { %3014 = vmatpush3.msra.mxu0 %v1930_v40  ;;  %v1978_v40 = vld [vmem:[%s5777_s6 + $0x1b0] sm:$0xff] }
 0x48f   :  { %3015 = vmatprep.subr.mxu0 %v1945_v46  ;;  %3051 = vmatprep.subr.mxu1 %v1978_v40  ;;  %v1761_v20 = vmax.f32 %v4834_v52, 0.0  ;;  %v1974_v40 = vld [vmem:[%s5777_s6 + $0x190] sm:$0xff] }
 0x490   :  { %3016 = vmatpush3.msra.mxu0 %v1929_v49 }
 0x491   :  { %3017 = vmatprep.subr.mxu0 %v1944_v37  ;;  %v1962_v37 = vld [vmem:[%s5777_s6 + $0x130] sm:$0xff] }
 0x492   :  { %3018 = vmatpush3.msra.mxu0 %v1928_v50  ;;  %v2019_v50 = vld [vmem:[%s5777_s6 + $0x2f8] sm:$0xff]  ;;  %3052 = vmatpush3.msra.mxu1 %v1962_v37 }
 0x493   :  { %3019 = vmatprep.subr.mxu0 %v1943_v54  ;;  %3053 = vmatprep.subr.mxu1 %v1977_v14  ;;  %v1972_v14 = vld [vmem:[%s5777_s6 + $0x180] sm:$0xff] }
 0x494   :  { %3020 = vmatpush3.msra.mxu0 %v1927_v0 }
 0x495   :  { %3021 = vmatprep.subr.mxu0 %v1942_v62 }
 0x496   :  { %3022 = vmatpush3.msra.mxu0 %v1926_v34  ;;  %v4831_v34 = vadd.f32 %v1662_v18, %v4536_v29  ;;  %v1976_v18 = vld [vmem:[%s5777_s6 + $0x1a0] sm:$0xff] }
 0x497   :  { %3023 = vmatprep.subr.mxu0 %v1941_v55  ;;  %v1961_v55 = vld [vmem:[%s5777_s6 + $0x128] sm:$0xff] }
 0x498   :  { %3024 = vmatpush3.msra.mxu0 %v1925_v6  ;;  %3054 = vmatpush3.msra.mxu1 %v1961_v55  ;;  %v1956_v55 = vld [vmem:[%s5777_s6 + $0x100] sm:$0xff] }
 0x499   :  { %3025 = vmatprep.subr.mxu0 %v1940_v58  ;;  %3055 = vmatprep.subr.mxu1 %v1976_v18 }
 0x49a   :  { %3026 = vmatpush3.msra.mxu0 %v1924_v44 }
 0x49b   :  { %3071 = vmatprep.subr.mxu0 %v2019_v50  ;;  %v1958_v50 = vld [vmem:[%s5777_s6 + $0x110] sm:$0xff] }
 0x4b2   :  { %v4763_v35 = vpop.permute.xlu0 %3302 }
 0x4b3   :  { %v3305_v11 = vunpack.i.h.bf16 %v4763_v35  ;;  %v3304_v63 = vunpack.i.l.bf16 %v4763_v35 }
 0x4b5   :  { %v1820_v46 = vsel %vm1147_vm13, %v3304_v63, %v3305_v11 }
 0x4b6   :  { %v4797_v32 = vpop.permute.xlu0 %3312  ;;  %v4850_v29 = vmax.f32 %v1745_v26, %v1820_v46  ;;  %v1760_v26 = vmax.f32 %v4831_v34, 0.0  ;;  %v2016_v34 = vld [vmem:[%s5777_s6 + $0x2e0] sm:$0xff] }
 0x4b7   :  { %v3315_v54 = vunpack.i.h.bf16 %v4797_v32  ;;  %v3314_v0 = vunpack.i.l.bf16 %v4797_v32 }
 0x4b8   :  { %v3351_v25 = vpack.i.bf16 %v1761_v20, %v1760_v26 }
 0x4b9   :  { %v1821_v22 = vsel %vm1147_vm13, %v3314_v0, %v3315_v54 }
 0x4ba   :  { %v4889_v46 = vmax.f32 %v1755_v5, %v1821_v22  ;;  %v1957_v5 = vld [vmem:[%s5777_s6 + $0x108] sm:$0xff] }
 0x4d6   :  { %v4815_v49 = vpop.permute.xlu1 %3307 }
 0x4d7   :  { %v3310_v17 = vunpack.i.h.bf16 %v4815_v49  ;;  %v3309_v62 = vunpack.i.l.bf16 %v4815_v49 }
 0x4d9   :  { %v1804_v43 = vsel %vm1147_vm13, %v3310_v17, %v3309_v62  ;;  %v1822_v6 = vsel %vm1147_vm13, %v3309_v62, %v3304_v63  ;;  %v1960_v63 = vld [vmem:[%s5777_s6 + $0x120] sm:$0xff]  ;;  %v1973_v62 = vld [vmem:[%s5777_s6 + $0x188] sm:$0xff] }
 0x4da   :  { %v4854_v30 = vmax.f32 %v1744_v24, %v1822_v6  ;;  %v4858_v58 = vmax.f32 %v1753_v31, %v1804_v43  ;;  %v4860_v7 = vpop.permute.xlu1 %3322  ;;  %3056 = vmatpush3.msra.mxu1 %v1960_v63  ;;  %v1975_v24 = vld [vmem:[%s5777_s6 + $0x198] sm:$0xff] }
 0x4db   :  { %v3324_v13 = vunpack.i.l.bf16 %v4860_v7  ;;  %3057 = vmatprep.subr.mxu1 %v1975_v24  ;;  %v3325_v2 = vunpack.i.h.bf16 %v4860_v7  ;;  %v2051_v6 = vld [vmem:[%s5777_s6 + $0x3f8] sm:$0xff] }
 0x4dc   :  { %1880 = vrot.lane.b32.xlu0 %v4858_v58, %s3401_s17  ;;  %v3346_v31 = vpack.i.bf16 %v4850_v29, %v4854_v30  ;;  %3058 = vmatpush3.msra.mxu1 %v1959_v27 }
 0x4dd   :  { %v1823_v44 = vsel %vm1147_vm13, %v3324_v13, %v3314_v0  ;;  %3059 = vmatprep.subr.mxu1 %v1974_v40  ;;  %v1805_v18 = vsel %vm1147_vm13, %v3325_v2, %v3324_v13 }
 0x4de   :  { %v4893_v37 = vmax.f32 %v1754_v42, %v1823_v44  ;;  %3347 = vrot.lane.b32.xlu1 %v3346_v31, %s3401_s17  ;;  %v3328_v0 = vpop.permute.xlu1 %3327  ;;  %3060 = vmatpush3.msra.mxu1 %v1958_v50  ;;  %v4939_v13 = vmax.f32 %v1763_v9, %v1805_v18 }
 0x4df   :  { %3061 = vmatprep.subr.mxu1 %v1973_v62  ;;  %v3329_v63 = vunpack.i.l.bf16 %v3328_v0  ;;  %v3330_v27 = vunpack.i.h.bf16 %v3328_v0 }
 0x4e0   :  { %v3356_v42 = vpack.i.bf16 %v4889_v46, %v4893_v37  ;;  %3062 = vmatpush3.msra.mxu1 %v1957_v5 }
 0x4e1   :  { %3063 = vmatprep.subr.mxu1 %v1972_v14  ;;  %v1812_v16 = vsel %vm1147_vm13, %v3329_v63, %v3330_v27 }
 0x4e2   :  { %3352 = vrot.lane.b32.xlu1 %v3351_v25, %s3405_s28  ;;  %3357 = vrot.lane.b32.xlu0 %v3356_v42, %s3401_s17  ;;  %v4927_v31 = vpop.permute.xlu1 %3337  ;;  %v4983_v32 = vmax.f32 %v1749_v60, %v1812_v16  ;;  %v2017_v16 = vld [vmem:[%s5777_s6 + $0x2e8] sm:$0xff] }
 0x4e3   :  { %v3318_v43 = vpop.permute.xlu0 %3317  ;;  %3064 = vmatpush3.msra.mxu1 %v1956_v55  ;;  %v3340_v42 = vunpack.i.h.bf16 %v4927_v31 }
 0x4e4   :  { %v3320_v22 = vunpack.i.h.bf16 %v3318_v43  ;;  %v3319_v24 = vunpack.i.l.bf16 %v3318_v43  ;;  %3109 = vmatprep.subr.mxu1 %v2051_v6 }
 0x4e6   :  { %v1814_v44 = vsel %vm1147_vm13, %v3320_v22, %v3329_v63  ;;  %v1816_v40 = vsel %vm1147_vm13, %v3319_v24, %v3320_v22  ;;  %v1818_v50 = vsel %vm1147_vm13, %v3305_v11, %v3319_v24  ;;  %v3339_v11 = vunpack.i.l.bf16 %v4927_v31 }
 0x4e7   :  { %v4943_v62 = vmax.f32 %v1746_v57, %v1818_v50  ;;  %v4947_v0 = vmax.f32 %v1747_v47, %v1816_v40  ;;  %v4951_v25 = vmax.f32 %v1748_v10, %v1814_v44  ;;  %v3333_v35 = vpop.permute.xlu0 %3332  ;;  %v2003_v50 = vld [vmem:[%s5777_s6 + $0x278] sm:$0xff] }
 0x4e8   :  { %v3335_v56 = vunpack.i.h.bf16 %v3333_v35  ;;  %v3334_v9 = vunpack.i.l.bf16 %v3333_v35  ;;  %v1813_v55 = vsel %vm1147_vm13, %v3339_v11, %v3340_v42 }
 0x4e9   :  { %v3366_v59 = vpack.i.bf16 %v4943_v62, %v4939_v13  ;;  %v3361_v57 = vpack.i.bf16 %v4951_v25, %v4947_v0  ;;  %v4993_v48 = vmax.f32 %v1759_v21, %v1813_v55 }
 0x4ea   :  { %v1815_v3 = vsel %vm1147_vm13, %v3335_v56, %v3339_v11  ;;  %v1817_v10 = vsel %vm1147_vm13, %v3334_v9, %v3335_v56  ;;  %v1819_v47 = vsel %vm1147_vm13, %v3315_v54, %v3334_v9  ;;  %v2002_v11 = vld [vmem:[%s5777_s6 + $0x270] sm:$0xff] }
 0x4eb   :  { %v4971_v5 = vmax.f32 %v1756_v28, %v1819_v47  ;;  %v4975_v14 = vmax.f32 %v1757_v45, %v1817_v10  ;;  %3367 = vrot.lane.b32.xlu1 %v3366_v59, %s3401_s17  ;;  %3362 = vrot.lane.b32.xlu0 %v3361_v57, %s3401_s17  ;;  %v4987_v23 = vmax.f32 %v1758_v41, %v1815_v3 }
 0x4ed   :  { %v3371_v28 = vpack.i.bf16 %v4975_v14, %v4971_v5  ;;  %v3376_v39 = vpack.i.bf16 %v4993_v48, %v4987_v23 }
 0x4ef   :  { %1864 = vrot.lane.b32.xlu1 %v4983_v32, %s3401_s17  ;;  %3372 = vrot.lane.b32.xlu0 %v3371_v28, %s3401_s17  ;;  %v2014_v28 = vld [vmem:[%s5777_s6 + $0x2d0] sm:$0xff] }
 0x4f3   :  { %3377 = vrot.lane.b32.xlu1 %v3376_v39, %s3401_s17  ;;  %v1998_v39 = vld [vmem:[%s5777_s6 + $0x250] sm:$0xff] }
 0x4f5   :  { %v3343_v60 = vpop.permute.xlu0 %3342 }
 0x4f6   :  { %v3345_v19 = vunpack.i.h.bf16 %v3343_v60  ;;  %v3344_v41 = vunpack.i.l.bf16 %v3343_v60  ;;  %v2013_v60 = vld [vmem:[%s5777_s6 + $0x2c8] sm:$0xff] }
 0x4f8   :  { %v1806_v61 = vsel %vm1147_vm13, %v3345_v19, %v3310_v17  ;;  %v1808_v21 = vsel %vm1147_vm13, %v3344_v41, %v3345_v19  ;;  %v1810_v45 = vsel %vm1147_vm13, %v3330_v27, %v3344_v41 }
 0x4f9   :  { %v5011_v54 = vmax.f32 %v1750_v8, %v1810_v45  ;;  %v5015_v43 = vmax.f32 %v1751_v33, %v1808_v21  ;;  %v5052_v9 = vmax.f32 %v1752_v15, %v1806_v61 }
 0x4fb   :  { %v3381_v49 = vpack.i.bf16 %v5015_v43, %v5011_v54 }
 0x4fd   :  { %3382 = vrot.lane.b32.xlu0 %v3381_v49, %s3401_s17 }
 0x54e   :  { %v5020_v17 = vpop.permute.xlu0 %1880 }
 0x550   :  { %v3348_v6 = vpop.permute.xlu1 %3347 }
 0x551   :  { %v3350_v18 = vunpack.i.h.bf16 %v3348_v6  ;;  %v3349_v63 = vunpack.i.l.bf16 %v3348_v6  ;;  %v1997_v6 = vld [vmem:[%s5777_s6 + $0x248] sm:$0xff] }
 0x553   :  { %v1902_v51 = vsel %vm1065_vm10, %v5020_v17, %v3349_v63  ;;  %v1900_v8 = vsel %vm1065_vm10, %v3349_v63, %v3350_v18 }
 0x554   :  { %v1904_v1 = vmax.f32 %v4854_v30, %v1902_v51  ;;  %v3353_v33 = vpop.permute.xlu1 %3352  ;;  %v5028_v22 = vpop.permute.xlu0 %3357  ;;  %v1905_v24 = vmax.f32 %v4850_v29, %v1900_v8  ;;  %v2018_v30 = vld [vmem:[%s5777_s6 + $0x2f0] sm:$0xff]  ;;  %v2012_v51 = vld [vmem:[%s5777_s6 + $0x2c0] sm:$0xff] }
 0x555   :  { %v3355_v31 = vunpack.i.h.bf16 %v3353_v33  ;;  %v3354_v27 = vunpack.i.l.bf16 %v3353_v33  ;;  %v3360_v44 = vunpack.i.h.bf16 %v5028_v22  ;;  %v3359_v40 = vunpack.i.l.bf16 %v5028_v22  ;;  %v1996_v33 = vld [vmem:[%s5777_s6 + $0x240] sm:$0xff]  ;;  %v1995_v22 = vld [vmem:[%s5777_s6 + $0x238] sm:$0xff] }
 0x556   :  { %2148 = vmatprep.mubr.f32.mxu0 %v1905_v24 }
 0x557   :  { %v1809_v35 = vsel %vm1147_vm13, %v3354_v27, %v3355_v31  ;;  %v1811_v29 = vsel %vm1147_vm13, %v3340_v42, %v3354_v27  ;;  %2149 = vmatmul.mubr.f32.vlgmr.msra.gmra.mxu0 %v1904_v1  ;;  %v1901_v56 = vsel %vm1065_vm10, %v3359_v40, %v3360_v44  ;;  %v1807_v52 = vsel %vm1147_vm13, %v3355_v31, %v3325_v2  ;;  %v1999_v2 = vld [vmem:[%s5777_s6 + $0x258] sm:$0xff]  ;;  %v2034_v27 = vld [vmem:[%s5777_s6 + $0x370] sm:$0xff] }
 0x558   :  { %v5056_v59 = vmax.f32 %v1760_v26, %v1811_v29  ;;  %v5060_v42 = vmax.f32 %v1761_v20, %v1809_v35  ;;  %3072 = vmatpush3.msra.mxu0 %v2003_v50  ;;  %v1915_v57 = vmax.f32 %v4889_v46, %v1901_v56  ;;  %v2000_v26 = vld [vmem:[%s5777_s6 + $0x260] sm:$0xff]  ;;  %v2015_v20 = vld [vmem:[%s5777_s6 + $0x2d8] sm:$0xff]  ;;  %v5096_v3 = vmax.f32 %v1762_v38, %v1807_v52  ;;  %v2049_v50 = vld [vmem:[%s5777_s6 + $0x3e8] sm:$0xff] }
 0x559   :  { %3073 = vmatprep.subr.mxu0 %v2018_v30  ;;  %v2035_v1 = vld [vmem:[%s5777_s6 + $0x378] sm:$0xff]  ;;  %v2033_v30 = vld [vmem:[%s5777_s6 + $0x368] sm:$0xff]  ;;  %v2048_v35 = vld [vmem:[%s5777_s6 + $0x3e0] sm:$0xff] }
 0x55a   :  { %3074 = vmatpush3.msra.mxu0 %v2002_v11  ;;  %1874 = vrot.lane.b32.xlu0 %v5060_v42, %s3401_s17  ;;  %v3386_v15 = vpack.i.bf16 %v5056_v59, %v5052_v9  ;;  %v2011_v31 = vld [vmem:[%s5777_s6 + $0x2b8] sm:$0xff]  ;;  %v2009_v29 = vld [vmem:[%s5777_s6 + $0x2a8] sm:$0xff]  ;;  %v2032_v11 = vld [vmem:[%s5777_s6 + $0x360] sm:$0xff] }
 0x55b   :  { %2153 = vmatprep.mubr.f32.mxu0 %v1915_v57  ;;  %3075 = vmatprep.subr.mxu0 %v2017_v16  ;;  %v1993_v56 = vld [vmem:[%s5777_s6 + $0x228] sm:$0xff]  ;;  %v2047_v57 = vld [vmem:[%s5777_s6 + $0x3d8] sm:$0xff]  ;;  %v2008_v16 = vld [vmem:[%s5777_s6 + $0x2a0] sm:$0xff] }
 0x55c   :  { %3076 = vmatpush3.msra.mxu0 %v2001_v36  ;;  %3387 = vrot.lane.b32.xlu1 %v3386_v15, %s3401_s17  ;;  %v2031_v36 = vld [vmem:[%s5777_s6 + $0x358] sm:$0xff]  ;;  %v1992_v15 = vld [vmem:[%s5777_s6 + $0x220] sm:$0xff] }
 0x55d   :  { %3077 = vmatprep.subr.mxu0 %v2016_v34  ;;  %v5087_v46 = vpop.permute.xlu1 %3367  ;;  %v5089_v7 = vpop.permute.xlu0 %3362  ;;  %v2046_v34 = vld [vmem:[%s5777_s6 + $0x3d0] sm:$0xff] }
 0x55e   :  { %v3370_v10 = vunpack.i.h.bf16 %v5087_v46  ;;  %v3369_v47 = vunpack.i.l.bf16 %v5087_v46  ;;  %3078 = vmatpush3.msra.mxu0 %v2000_v26  ;;  %v3364_v55 = vunpack.i.l.bf16 %v5089_v7  ;;  %v3365_v38 = vunpack.i.h.bf16 %v5089_v7  ;;  %v2007_v26 = vld [vmem:[%s5777_s6 + $0x298] sm:$0xff]  ;;  %v2042_v7 = vld [vmem:[%s5777_s6 + $0x3b0] sm:$0xff]  ;;  %v2459_v46 = vld [vmem:[%s5778_s7] sm:$0xff] }
 0x55f   :  { %3079 = vmatprep.subr.mxu0 %v2015_v20  ;;  %v2030_v20 = vld [vmem:[%s5777_s6 + $0x350] sm:$0xff] }
 0x560   :  { %v1898_v53 = vsel %vm1065_vm10, %v3350_v18, %v3370_v10  ;;  %3080 = vmatpush3.msra.mxu0 %v1999_v2  ;;  %1878 = vrot.lane.b32.xlu1 %v5096_v3, %s3401_s17  ;;  %v1903_v19 = vsel %vm1065_vm10, %v3369_v47, %v3359_v40  ;;  %v1896_v49 = vsel %vm1065_vm10, %v3370_v10, %v3364_v55  ;;  %v1991_v2 = vld [vmem:[%s5777_s6 + $0x218] sm:$0xff] }
 0x561   :  { %v1906_v41 = vmax.f32 %v4943_v62, %v1898_v53  ;;  %3081 = vmatprep.subr.mxu0 %v2014_v28  ;;  %v5120_v61 = vpop.permute.xlu1 %1864  ;;  %v5122_v21 = vpop.permute.xlu0 %3372  ;;  %v1914_v45 = vmax.f32 %v4893_v37, %v1903_v19  ;;  %v1907_v63 = vmax.f32 %v4947_v0, %v1896_v49  ;;  %v2050_v0 = vld [vmem:[%s5777_s6 + $0x3f0] sm:$0xff]  ;;  %v2045_v28 = vld [vmem:[%s5777_s6 + $0x3c8] sm:$0xff] }
 0x562   :  { %v1892_v62 = vsel %vm1065_vm10, %v3365_v38, %v5120_v61  ;;  %3082 = vmatpush3.msra.mxu0 %v1998_v39  ;;  %v3375_v18 = vunpack.i.h.bf16 %v5122_v21  ;;  %v3374_v37 = vunpack.i.l.bf16 %v5122_v21  ;;  %v2029_v19 = vld [vmem:[%s5777_s6 + $0x348] sm:$0xff]  ;;  %v1990_v49 = vld [vmem:[%s5777_s6 + $0x210] sm:$0xff]  ;;  %v2040_v21 = vld [vmem:[%s5777_s6 + $0x3a0] sm:$0xff] }
 0x563   :  { %v1909_v8 = vmax.f32 %v4983_v32, %v1892_v62  ;;  %3083 = vmatprep.subr.mxu0 %v2013_v60  ;;  %2154 = vmatmul.mubr.f32.gmra.mxu0 %v1914_v45  ;;  %v2006_v60 = vld [vmem:[%s5777_s6 + $0x290] sm:$0xff]  ;;  %v2005_v62 = vld [vmem:[%s5777_s6 + $0x288] sm:$0xff] }
 0x564   :  { %2223 = vmatprep.mubr.f32.mxu1 %v1907_v63  ;;  %3084 = vmatpush3.msra.mxu0 %v1997_v6  ;;  %v1897_v32 = vsel %vm1065_vm10, %v3374_v37, %v3375_v18  ;;  %v1899_v24 = vsel %vm1065_vm10, %v3360_v44, %v3374_v37  ;;  %v2044_v6 = vld [vmem:[%s5777_s6 + $0x3c0] sm:$0xff] }
 0x565   :  { %2224 = vmatmul.mubr.f32.vlgmr.msra.gmra.mxu1 %v1906_v41  ;;  %3085 = vmatprep.subr.mxu0 %v2012_v51  ;;  %v1917_v40 = vmax.f32 %v4975_v14, %v1897_v32  ;;  %v1916_v44 = vmax.f32 %v4971_v5, %v1899_v24  ;;  %v2010_v14 = vld [vmem:[%s5777_s6 + $0x2b0] sm:$0xff]  ;;  %v5211_v52 = vpop.permute.xlu1 %3377  ;;  %v2028_v37 = vld [vmem:[%s5777_s6 + $0x340] sm:$0xff]  ;;  %v1989_v51 = vld [vmem:[%s5777_s6 + $0x208] sm:$0xff] }
 0x566   :  { %3110 = vmatpush3.msra.mxu1 %v2035_v1  ;;  %3086 = vmatpush3.msra.mxu0 %v1996_v33  ;;  %v1994_v5 = vld [vmem:[%s5777_s6 + $0x230] sm:$0xff]  ;;  %v3380_v41 = vunpack.i.h.bf16 %v5211_v52  ;;  %v3379_v45 = vunpack.i.l.bf16 %v5211_v52  ;;  %v1894_v1 = vsel %vm1065_vm10, %v3364_v55, %v3365_v38  ;;  %v2004_v33 = vld [vmem:[%s5777_s6 + $0x280] sm:$0xff] }
 0x567   :  { %2298 = vmatprep.mubr.f32.mxu0 %v1909_v8  ;;  %3111 = vmatprep.subr.mxu1 %v2050_v0  ;;  %v2043_v8 = vld [vmem:[%s5777_s6 + $0x3b8] sm:$0xff]  ;;  %v1988_v32 = vld [vmem:[%s5777_s6 + $0x200] sm:$0xff]  ;;  %v1908_v24 = vmax.f32 %v4951_v25, %v1894_v1 }
 0x568   :  { %3087 = vmatprep.subr.mxu0 %v2011_v31  ;;  %3112 = vmatpush3.msra.mxu1 %v2034_v27  ;;  %v2027_v0 = vld [vmem:[%s5777_s6 + $0x338] sm:$0xff]  ;;  %v1893_v38 = vsel %vm1065_vm10, %v3379_v45, %v3380_v41  ;;  %v2026_v31 = vld [vmem:[%s5777_s6 + $0x330] sm:$0xff]  ;;  %v2056_v1 = vld [vmem:[%s5777_s6 + $0x420] sm:$0xff] }
 0x569   :  { %2228 = vmatprep.mubr.f32.mxu1 %v1917_v40  ;;  %3088 = vmatpush3.msra.mxu0 %v1995_v22  ;;  %v1919_v27 = vmax.f32 %v4993_v48, %v1893_v38  ;;  %v1895_v40 = vsel %vm1065_vm10, %v3375_v18, %v3379_v45  ;;  %v2083_v25 = vld [vmem:[%s5777_s6 + $0x4f8] sm:$0xff]  ;;  %v2025_v22 = vld [vmem:[%s5777_s6 + $0x328] sm:$0xff]  ;;  %v2076_v45 = vld [vmem:[%s5777_s6 + $0x4c0] sm:$0xff] }
 0x56a   :  { %3113 = vmatprep.subr.mxu1 %v2049_v50  ;;  %2229 = vmatmul.mubr.f32.gmra.mxu1 %v1916_v44  ;;  %v2067_v48 = vld [vmem:[%s5777_s6 + $0x478] sm:$0xff]  ;;  %v1918_v18 = vmax.f32 %v4987_v23, %v1895_v40  ;;  %v2024_v44 = vld [vmem:[%s5777_s6 + $0x320] sm:$0xff]  ;;  %v2082_v50 = vld [vmem:[%s5777_s6 + $0x4f0] sm:$0xff] }
 0x56b   :  { %3089 = vmatprep.subr.mxu0 %v2010_v14  ;;  %3114 = vmatpush3.msra.mxu1 %v2033_v30  ;;  %v2039_v14 = vld [vmem:[%s5777_s6 + $0x398] sm:$0xff]  ;;  %v2066_v30 = vld [vmem:[%s5777_s6 + $0x470] sm:$0xff]  ;;  %v2053_v38 = vld [vmem:[%s5777_s6 + $0x408] sm:$0xff] }
 0x56c   :  { %3090 = vmatpush3.msra.mxu0 %v1994_v5  ;;  %3115 = vmatprep.subr.mxu1 %v2048_v35  ;;  %v2023_v23 = vld [vmem:[%s5777_s6 + $0x318] sm:$0xff]  ;;  %v2081_v5 = vld [vmem:[%s5777_s6 + $0x4e8] sm:$0xff]  ;;  %v2038_v35 = vld [vmem:[%s5777_s6 + $0x390] sm:$0xff] }
 0x56d   :  { %3091 = vmatprep.subr.mxu0 %v2009_v29  ;;  %3116 = vmatpush3.msra.mxu1 %v2032_v11  ;;  %v2065_v29 = vld [vmem:[%s5777_s6 + $0x468] sm:$0xff]  ;;  %v2022_v11 = vld [vmem:[%s5777_s6 + $0x310] sm:$0xff] }
 0x56e   :  { %3092 = vmatpush3.msra.mxu0 %v1993_v56  ;;  %3117 = vmatprep.subr.mxu1 %v2047_v57  ;;  %v2080_v56 = vld [vmem:[%s5777_s6 + $0x4e0] sm:$0xff]  ;;  %v2037_v57 = vld [vmem:[%s5777_s6 + $0x388] sm:$0xff] }
 0x56f   :  { %3093 = vmatprep.subr.mxu0 %v2008_v16  ;;  %3118 = vmatpush3.msra.mxu1 %v2031_v36  ;;  %v5222_v10 = vpop.permute.xlu0 %3382  ;;  %v2064_v16 = vld [vmem:[%s5777_s6 + $0x460] sm:$0xff]  ;;  %v2021_v36 = vld [vmem:[%s5777_s6 + $0x308] sm:$0xff] }
 0x570   :  { %3094 = vmatpush3.msra.mxu0 %v1992_v15  ;;  %3119 = vmatprep.subr.mxu1 %v2046_v34  ;;  %v3385_v39 = vunpack.i.h.bf16 %v5222_v10  ;;  %v3384_v53 = vunpack.i.l.bf16 %v5222_v10  ;;  %v2079_v15 = vld [vmem:[%s5777_s6 + $0x4d8] sm:$0xff] }
 0x571   :  { %3095 = vmatprep.subr.mxu0 %v2007_v26  ;;  %3120 = vmatpush3.msra.mxu1 %v2030_v20  ;;  %v2036_v26 = vld [vmem:[%s5777_s6 + $0x380] sm:$0xff]  ;;  %v2063_v20 = vld [vmem:[%s5777_s6 + $0x458] sm:$0xff] }
 0x572   :  { %3096 = vmatpush3.msra.mxu0 %v1991_v2  ;;  %3121 = vmatprep.subr.mxu1 %v2045_v28  ;;  %v1888_v63 = vsel %vm1065_vm10, %v3384_v53, %v3385_v39  ;;  %v1890_v34 = vsel %vm1065_vm10, %v5120_v61, %v3384_v53  ;;  %v2020_v2 = vld [vmem:[%s5777_s6 + $0x300] sm:$0xff]  ;;  %v2078_v61 = vld [vmem:[%s5777_s6 + $0x4d0] sm:$0xff] }
 0x573   :  { %3097 = vmatprep.subr.mxu0 %v2006_v60  ;;  %3122 = vmatpush3.msra.mxu1 %v2029_v19  ;;  %v1911_v55 = vmax.f32 %v5015_v43, %v1888_v63  ;;  %v2041_v43 = vld [vmem:[%s5777_s6 + $0x3a8] sm:$0xff]  ;;  %v2062_v28 = vld [vmem:[%s5777_s6 + $0x450] sm:$0xff]  ;;  %v1910_v53 = vmax.f32 %v5011_v54, %v1890_v34  ;;  %v2060_v54 = vld [vmem:[%s5777_s6 + $0x440] sm:$0xff] }
 0x574   :  { %3098 = vmatpush3.msra.mxu0 %v1990_v49  ;;  %3123 = vmatprep.subr.mxu1 %v2044_v6  ;;  %v2077_v60 = vld [vmem:[%s5777_s6 + $0x4c8] sm:$0xff]  ;;  %v2075_v49 = vld [vmem:[%s5777_s6 + $0x4b8] sm:$0xff] }
 0x575   :  { %3099 = vmatprep.subr.mxu0 %v2005_v62  ;;  %3124 = vmatpush3.msra.mxu1 %v2028_v37  ;;  %v2061_v19 = vld [vmem:[%s5777_s6 + $0x448] sm:$0xff]  ;;  %v2059_v6 = vld [vmem:[%s5777_s6 + $0x438] sm:$0xff]  ;;  %v2074_v62 = vld [vmem:[%s5777_s6 + $0x4b0] sm:$0xff] }
 0x576   :  { %3100 = vmatpush3.msra.mxu0 %v1989_v51  ;;  %3125 = vmatprep.subr.mxu1 %v2043_v8  ;;  %v2058_v37 = vld [vmem:[%s5777_s6 + $0x430] sm:$0xff]  ;;  %v2073_v63 = vld [vmem:[%s5777_s6 + $0x4a8] sm:$0xff]  ;;  %v2072_v8 = vld [vmem:[%s5777_s6 + $0x4a0] sm:$0xff] }
 0x577   :  { %3101 = vmatprep.subr.mxu0 %v2004_v33  ;;  %3126 = vmatpush3.msra.mxu1 %v2027_v0  ;;  %v2057_v51 = vld [vmem:[%s5777_s6 + $0x428] sm:$0xff]  ;;  %v2071_v33 = vld [vmem:[%s5777_s6 + $0x498] sm:$0xff] }
 0x578   :  { %3102 = vmatpush3.msra.mxu0 %v1988_v32  ;;  %3127 = vmatprep.subr.mxu1 %v2042_v7  ;;  %v2055_v0 = vld [vmem:[%s5777_s6 + $0x418] sm:$0xff]  ;;  %v2070_v32 = vld [vmem:[%s5777_s6 + $0x490] sm:$0xff] }
 0x579   :  { %2373 = vmatprep.mubr.f32.mxu1 %v1911_v55  ;;  %2299 = vmatmul.mubr.f32.vlgmr.msra.gmra.mxu0 %v1908_v24  ;;  %v2054_v7 = vld [vmem:[%s5777_s6 + $0x410] sm:$0xff]  ;;  %v2069_v55 = vld [vmem:[%s5777_s6 + $0x488] sm:$0xff]  ;;  %v2068_v24 = vld [vmem:[%s5777_s6 + $0x480] sm:$0xff] }
 0x57a   :  { %3128 = vmatpush3.msra.mxu1 %v2026_v31  ;;  %2303 = vmatprep.mubr.f32.mxu0 %v1919_v27  ;;  %v2052_v31 = vld [vmem:[%s5777_s6 + $0x400] sm:$0xff]  ;;  %v2472_v27 = vld [vmem:[%s5778_s7 + $0x68] sm:$0xff] }
 0x57b   :  { %3129 = vmatprep.subr.mxu1 %v2041_v43  ;;  %3147 = vmatprep.subr.mxu0 %v2083_v25  ;;  %v2471_v43 = vld [vmem:[%s5778_s7 + $0x60] sm:$0xff] }
 0x57c   :  { %3130 = vmatpush3.msra.mxu1 %v2025_v22  ;;  %3148 = vmatpush3.msra.mxu0 %v2067_v48 }
 0x57d   :  { %3131 = vmatprep.subr.mxu1 %v2040_v21  ;;  %2304 = vmatmul.mubr.f32.gmra.mxu0 %v1918_v18 }
 0x57e   :  { %3132 = vmatpush3.msra.mxu1 %v2024_v44  ;;  %3149 = vmatprep.subr.mxu0 %v2082_v50 }
 0x57f   :  { %3133 = vmatprep.subr.mxu1 %v2039_v14  ;;  %3150 = vmatpush3.msra.mxu0 %v2066_v30 }
 0x580   :  { %3134 = vmatpush3.msra.mxu1 %v2023_v23  ;;  %3151 = vmatprep.subr.mxu0 %v2081_v5 }
 0x581   :  { %3135 = vmatprep.subr.mxu1 %v2038_v35  ;;  %3152 = vmatpush3.msra.mxu0 %v2065_v29 }
 0x582   :  { %3136 = vmatpush3.msra.mxu1 %v2022_v11  ;;  %3153 = vmatprep.subr.mxu0 %v2080_v56 }
 0x583   :  { %3137 = vmatprep.subr.mxu1 %v2037_v57  ;;  %3154 = vmatpush3.msra.mxu0 %v2064_v16 }
 0x584   :  { %3138 = vmatpush3.msra.mxu1 %v2021_v36  ;;  %3155 = vmatprep.subr.mxu0 %v2079_v15 }
 0x585   :  { %3139 = vmatprep.subr.mxu1 %v2036_v26  ;;  %3156 = vmatpush3.msra.mxu0 %v2063_v20 }
 0x586   :  { %3140 = vmatpush3.msra.mxu1 %v2020_v2  ;;  %3157 = vmatprep.subr.mxu0 %v2078_v61 }
 0x587   :  { %2374 = vmatmul.mubr.f32.vlgmr.msra.gmra.mxu1 %v1910_v53  ;;  %3158 = vmatpush3.msra.mxu0 %v2062_v28 }
 0x588   :  { %3159 = vmatprep.subr.mxu0 %v2077_v60  ;;  %2506 = vmatprep.subr.mxu1 %v2472_v27 }
 0x589   :  { %3160 = vmatpush3.msra.mxu0 %v2061_v19  ;;  %2507 = vmatpush1.msra.mxu1 %v2471_v43 }
 0x58a   :  { %3161 = vmatprep.subr.mxu0 %v2076_v45 }
 0x58b   :  { %3162 = vmatpush3.msra.mxu0 %v2060_v54 }
 0x58c   :  { %3163 = vmatprep.subr.mxu0 %v2075_v49 }
 0x58d   :  { %3164 = vmatpush3.msra.mxu0 %v2059_v6 }
 0x58e   :  { %3165 = vmatprep.subr.mxu0 %v2074_v62 }
 0x58f   :  { %3166 = vmatpush3.msra.mxu0 %v2058_v37 }
 0x590   :  { %3167 = vmatprep.subr.mxu0 %v2073_v63 }
 0x591   :  { %3168 = vmatpush3.msra.mxu0 %v2057_v51 }
 0x592   :  { %3169 = vmatprep.subr.mxu0 %v2072_v8 }
 0x593   :  { %3170 = vmatpush3.msra.mxu0 %v2056_v1 }
 0x594   :  { %3171 = vmatprep.subr.mxu0 %v2071_v33 }
 0x595   :  { %3172 = vmatpush3.msra.mxu0 %v2055_v0 }
 0x596   :  { %3173 = vmatprep.subr.mxu0 %v2070_v32 }
 0x597   :  { %3174 = vmatpush3.msra.mxu0 %v2054_v7 }
 0x598   :  { %3175 = vmatprep.subr.mxu0 %v2069_v55 }
 0x599   :  { %3176 = vmatpush3.msra.mxu0 %v2053_v38  ;;  %v2473_v38 = vld [vmem:[%s5778_s7 + $0x70] sm:$0xff] }
 0x59a   :  { %3177 = vmatprep.subr.mxu0 %v2068_v24 }
 0x59b   :  { %3178 = vmatpush3.msra.mxu0 %v2052_v31  ;;  %v2470_v31 = vld [vmem:[%s5778_s7 + $0x58] sm:$0xff] }
 0x5cc   :  { %v1875_v48 = vpop.permute.xlu0 %1874 }
 0x5ce   :  { %v3388_v40 = vpop.permute.xlu1 %3387 }
 0x5cf   :  { %v3390_v25 = vunpack.i.h.bf16 %v3388_v40  ;;  %v3389_v22 = vunpack.i.l.bf16 %v3388_v40  ;;  %v2469_v40 = vld [vmem:[%s5778_s7 + $0x50] sm:$0xff] }
 0x5d1   :  { %v1886_v21 = vsel %vm1065_vm10, %v3385_v39, %v3389_v22  ;;  %v1889_v18 = vsel %vm1065_vm10, %v3390_v25, %v1875_v48  ;;  %v1884_v44 = vsel %vm1065_vm10, %v3389_v22, %v5020_v17  ;;  %v1891_v50 = vsel %vm1065_vm10, %v3380_v41, %v3390_v25  ;;  %v2466_v25 = vld [vmem:[%s5778_s7 + $0x38] sm:$0xff] }
 0x5d2   :  { %v1912_v14 = vmax.f32 %v5052_v9, %v1886_v21  ;;  %v1879_v30 = vpop.permute.xlu1 %1878  ;;  %v1921_v10 = vmax.f32 %v5060_v42, %v1889_v18  ;;  %v1913_v23 = vmax.f32 %v4858_v58, %v1884_v44  ;;  %v1920_v39 = vmax.f32 %v5056_v59, %v1891_v50  ;;  %v2468_v9 = vld [vmem:[%s5778_s7 + $0x48] sm:$0xff]  ;;  %v2463_v59 = vld [vmem:[%s5778_s7 + $0x20] sm:$0xff]  ;;  %v2462_v21 = vld [vmem:[%s5778_s7 + $0x18] sm:$0xff] }
 0x5d3   :  { %v1885_v5 = vsel %vm1065_vm10, %v1879_v30, %v3369_v47  ;;  %v1887_v17 = vsel %vm1065_vm10, %v1875_v48, %v1879_v30  ;;  %2508 = vmatprep.subr.mxu1 %v2468_v9  ;;  %v2460_v42 = vld [vmem:[%s5778_s7 + $0x8] sm:$0xff]  ;;  %v2465_v48 = vld [vmem:[%s5778_s7 + $0x30] sm:$0xff]  ;;  %v2711_v44 = vld [vmem:[%s5779_s9 + $0xf8] sm:$0xff] }
 0x5d4   :  { %v1923_v52 = vmax.f32 %v4939_v13, %v1885_v5  ;;  %2378 = vmatprep.mubr.f32.mxu1 %v1921_v10  ;;  %2448 = vmatprep.mubr.f32.mxu0 %v1913_v23  ;;  %v1922_v58 = vmax.f32 %v5096_v3, %v1887_v17  ;;  %v2464_v13 = vld [vmem:[%s5778_s7 + $0x28] sm:$0xff]  ;;  %v2474_v3 = vld [vmem:[%s5778_s7 + $0x78] sm:$0xff]  ;;  %v2461_v18 = vld [vmem:[%s5778_s7 + $0x10] sm:$0xff] }
 0x5d5   :  { %2379 = vmatmul.mubr.f32.gmra.mxu1 %v1920_v39  ;;  %2449 = vmatmul.mubr.f32.vlgmr.msra.gmra.mxu0 %v1912_v14  ;;  %v2695_v50 = vld [vmem:[%s5779_s9 + $0x78] sm:$0xff]  ;;  %v2710_v14 = vld [vmem:[%s5779_s9 + $0xf0] sm:$0xff]  ;;  %v2709_v10 = vld [vmem:[%s5779_s9 + $0xe8] sm:$0xff] }
 0x5d6   :  { %2453 = vmatprep.mubr.f32.mxu0 %v1923_v52  ;;  %2546 = vmatprep.mubr.f32.mxu1 %v3397_v4  ;;  %v2694_v30 = vld [vmem:[%s5779_s9 + $0x70] sm:$0xff]  ;;  %v2693_v23 = vld [vmem:[%s5779_s9 + $0x68] sm:$0xff]  ;;  %v2708_v39 = vld [vmem:[%s5779_s9 + $0xe0] sm:$0xff] }
 0x5d7   :  { %2509 = vmatpush1.msra.mxu1 %v2467_v12  ;;  %v2692_v5 = vld [vmem:[%s5779_s9 + $0x60] sm:$0xff]  ;;  %v2707_v17 = vld [vmem:[%s5779_s9 + $0xd8] sm:$0xff]  ;;  %v2706_v12 = vld [vmem:[%s5779_s9 + $0xd0] sm:$0xff] }
 0x5d8   :  { %2510 = vmatprep.subr.mxu1 %v2464_v13  ;;  %v2743_v52 = vld [vmem:[%s5779_s9 + $0x1f8] sm:$0xff]  ;;  %v2742_v13 = vld [vmem:[%s5779_s9 + $0x1f0] sm:$0xff] }
 0x5d9   :  { %2454 = vmatmul.mubr.f32.gmra.mxu0 %v1922_v58  ;;  %2511 = vmatpush1.msra.mxu1 %v2463_v59  ;;  %v2691_v58 = vld [vmem:[%s5779_s9 + $0x58] sm:$0xff]  ;;  %v2690_v59 = vld [vmem:[%s5779_s9 + $0x50] sm:$0xff] }
 0x5da   :  { %2512 = vmatprep.subr.mxu1 %v2460_v42  ;;  %3220 = vmatprep.subr.mxu0 %v2743_v52  ;;  %v2727_v9 = vld [vmem:[%s5779_s9 + $0x178] sm:$0xff]  ;;  %v2726_v42 = vld [vmem:[%s5779_s9 + $0x170] sm:$0xff] }
 0x5db   :  { %2513 = vmatpush1.msra.mxu1 %v2459_v46  ;;  %3221 = vmatpush3.msra.mxu0 %v2727_v9  ;;  %v2705_v46 = vld [vmem:[%s5779_s9 + $0xc8] sm:$0xff] }
 0x5dc   :  { %2583 = vmatprep.subr.mxu1 %v2474_v3  ;;  %3222 = vmatprep.subr.mxu0 %v2742_v13  ;;  %v2741_v3 = vld [vmem:[%s5779_s9 + $0x1e8] sm:$0xff] }
 0x5dd   :  { %3223 = vmatpush3.msra.mxu0 %v2726_v42 }
 0x5de   :  { %3224 = vmatprep.subr.mxu0 %v2741_v3  ;;  %v2638_v3 = vld [vmem:[%s5780_s8 + $0x10] sm:$0xff] }
 0x617   :  { %v3027_v47 = vpop.f32.mrf.mxu0 }
 0x619   :  { %v3028_v41 = vpop.f32.mrf.mxu0 }
 0x61a   :  { %v3029_v61 = vadd.f32 %v3028_v41, %v3027_v47  ;;  %v2689_v47 = vld [vmem:[%s5779_s9 + $0x48] sm:$0xff] }
 0x61b   :  { %v2725_v41 = vld [vmem:[%s5779_s9 + $0x168] sm:$0xff] }
 0x61c   :  { %3225 = vmatpush3.msra.mxu0 %v2725_v41  ;;  %v2642_v41 = vld [vmem:[%s5780_s8 + $0x30] sm:$0xff] }
 0x623   :  { %v3030_v29 = vpop.f32.mrf.mxu0 }
 0x625   :  { %v3065_v35 = vpop.f32.mrf.mxu1  ;;  %v3031_v56 = vpop.f32.mrf.mxu0 }
 0x626   :  { %v3032_v6 = vadd.f32 %v3031_v56, %v3030_v29  ;;  %v2740_v29 = vld [vmem:[%s5779_s9 + $0x1e0] sm:$0xff] }
 0x627   :  { %v3066_v11 = vpop.f32.mrf.mxu1  ;;  %3226 = vmatprep.subr.mxu0 %v2740_v29  ;;  %v2724_v56 = vld [vmem:[%s5779_s9 + $0x160] sm:$0xff] }
 0x628   :  { %v3067_v20 = vadd.f32 %v3066_v11, %v3065_v35  ;;  %v2704_v35 = vld [vmem:[%s5779_s9 + $0xc0] sm:$0xff]  ;;  %3227 = vmatpush3.msra.mxu0 %v2724_v56 }
 0x629   :  { %v2688_v11 = vld [vmem:[%s5779_s9 + $0x40] sm:$0xff] }
 0x62a   :  { %v3068_v57 = vpop.f32.mrf.mxu1  ;;  %v2226_v60 = vadd.f32 %v3067_v20, %v3029_v61  ;;  %v2686_v20 = vld [vmem:[%s5779_s9 + $0x30] sm:$0xff]  ;;  %v2701_v61 = vld [vmem:[%s5779_s9 + $0xa8] sm:$0xff] }
 0x62c   :  { %v3069_v36 = vpop.f32.mrf.mxu1 }
 0x62d   :  { %v3070_v19 = vadd.f32 %v3069_v36, %v3068_v57  ;;  %v2703_v57 = vld [vmem:[%s5779_s9 + $0xb8] sm:$0xff] }
 0x62e   :  { %v2687_v36 = vld [vmem:[%s5779_s9 + $0x38] sm:$0xff] }
 0x62f   :  { %v2231_v8 = vadd.f32 %v3070_v19, %v3032_v6  ;;  %v2700_v19 = vld [vmem:[%s5779_s9 + $0xa0] sm:$0xff]  ;;  %v2699_v6 = vld [vmem:[%s5779_s9 + $0x98] sm:$0xff] }
 0x639   :  { %v3103_v16 = vpop.f32.mrf.mxu0 }
 0x63b   :  { %v3104_v15 = vpop.f32.mrf.mxu0 }
 0x63c   :  { %v3105_v28 = vadd.f32 %v3104_v15, %v3103_v16  ;;  %v2739_v16 = vld [vmem:[%s5779_s9 + $0x1d8] sm:$0xff] }
 0x63d   :  { %v3106_v26 = vpop.f32.mrf.mxu0  ;;  %3228 = vmatprep.subr.mxu0 %v2739_v16  ;;  %v2723_v15 = vld [vmem:[%s5779_s9 + $0x158] sm:$0xff] }
 0x63e   :  { %v2301_v62 = vadd.f32 %v3105_v28, %v2226_v60  ;;  %3229 = vmatpush3.msra.mxu0 %v2723_v15  ;;  %v2737_v28 = vld [vmem:[%s5779_s9 + $0x1c8] sm:$0xff] }
 0x63f   :  { %v3107_v53 = vpop.f32.mrf.mxu0  ;;  %v2721_v60 = vld [vmem:[%s5779_s9 + $0x148] sm:$0xff] }
 0x640   :  { %v3108_v37 = vadd.f32 %v3107_v53, %v3106_v26  ;;  %v2738_v26 = vld [vmem:[%s5779_s9 + $0x1d0] sm:$0xff]  ;;  %v2685_v53 = vld [vmem:[%s5779_s9 + $0x28] sm:$0xff] }
 0x641   :  { %3230 = vmatprep.subr.mxu0 %v2738_v26 }
 0x642   :  { %v2306_v7 = vadd.f32 %v3108_v37, %v2231_v8  ;;  %v2683_v37 = vld [vmem:[%s5779_s9 + $0x18] sm:$0xff]  ;;  %v2734_v8 = vld [vmem:[%s5779_s9 + $0x1b0] sm:$0xff] }
 0x647   :  { %v3141_v34 = vpop.f32.mrf.mxu1 }
 0x649   :  { %v3142_v2 = vpop.f32.mrf.mxu1 }
 0x64a   :  { %v3143_v45 = vadd.f32 %v3142_v2, %v3141_v34  ;;  %v2702_v34 = vld [vmem:[%s5779_s9 + $0xb0] sm:$0xff] }
 0x64b   :  { %v2722_v2 = vld [vmem:[%s5779_s9 + $0x150] sm:$0xff] }
 0x64c   :  { %v2376_v1 = vadd.f32 %v3143_v45, %v2301_v62  ;;  %3231 = vmatpush3.msra.mxu0 %v2722_v2  ;;  %v2736_v45 = vld [vmem:[%s5779_s9 + $0x1c0] sm:$0xff]  ;;  %v2735_v62 = vld [vmem:[%s5779_s9 + $0x1b8] sm:$0xff] }
 0x64d   :  { %3232 = vmatprep.subr.mxu0 %v2737_v28 }
 0x64e   :  { %3233 = vmatpush3.msra.mxu0 %v2721_v60 }
 0x64f   :  { %3234 = vmatprep.subr.mxu0 %v2736_v45 }
 0x695   :  { %v3144_v54 = vpop.f32.mrf.mxu1  ;;  %v3179_v49 = vpop.f32.mrf.mxu0 }
 0x697   :  { %v3145_v63 = vpop.f32.mrf.mxu1  ;;  %v3180_v51 = vpop.f32.mrf.mxu0 }
 0x698   :  { %v3146_v33 = vadd.f32 %v3145_v63, %v3144_v54  ;;  %v3181_v0 = vadd.f32 %v3180_v51, %v3179_v49  ;;  %v2684_v54 = vld [vmem:[%s5779_s9 + $0x20] sm:$0xff]  ;;  %v2719_v63 = vld [vmem:[%s5779_s9 + $0x138] sm:$0xff]  ;;  %v2698_v51 = vld [vmem:[%s5779_s9 + $0x90] sm:$0xff] }
 0x699   :  { %v3182_v32 = vpop.f32.mrf.mxu0  ;;  %v2720_v49 = vld [vmem:[%s5779_s9 + $0x140] sm:$0xff] }
 0x69a   :  { %v2451_v55 = vadd.f32 %v3181_v0, %v2376_v1  ;;  %v2381_v27 = vadd.f32 %v3146_v33, %v2306_v7  ;;  %3235 = vmatpush3.msra.mxu0 %v2720_v49  ;;  %v2682_v1 = vld [vmem:[%s5779_s9 + $0x10] sm:$0xff]  ;;  %v2697_v0 = vld [vmem:[%s5779_s9 + $0x88] sm:$0xff] }
 0x69b   :  { %v3183_v24 = vpop.f32.mrf.mxu0  ;;  %3236 = vmatprep.subr.mxu0 %v2735_v62  ;;  %v2718_v33 = vld [vmem:[%s5779_s9 + $0x130] sm:$0xff]  ;;  %v2681_v7 = vld [vmem:[%s5779_s9 + $0x8] sm:$0xff] }
 0x69c   :  { %v3184_v43 = vadd.f32 %v3183_v24, %v3182_v32  ;;  %2990 = vmatmul.mubr.msk.f32.vlgmr.msra.gmra.mxu1 %vm2475_vm14, %v2451_v55  ;;  %3237 = vmatpush3.msra.mxu0 %v2719_v63  ;;  %v2733_v32 = vld [vmem:[%s5779_s9 + $0x1a8] sm:$0xff]  ;;  %v2732_v24 = vld [vmem:[%s5779_s9 + $0x1a0] sm:$0xff] }
 0x69d   :  { %2584 = vmatpush1.msra.mxu1 %v2473_v38  ;;  %2552 = vmatprep.mubr.f32.mxu1 %v3397_v4  ;;  %v2696_v38 = vld [vmem:[%s5779_s9 + $0x80] sm:$0xff] }
 0x69e   :  { %v2456_v22 = vadd.f32 %v3184_v43, %v2381_v27  ;;  %2585 = vmatprep.subr.mxu1 %v2470_v31  ;;  %3238 = vmatprep.subr.mxu0 %v2734_v8  ;;  %v2680_v31 = vld [vmem:[%s5779_s9] sm:$0xff]  ;;  %v2731_v43 = vld [vmem:[%s5779_s9 + $0x198] sm:$0xff] }
 0x69f   :  { %2586 = vmatpush1.msra.mxu1 %v2469_v40  ;;  %3239 = vmatpush3.msra.mxu0 %v2718_v33  ;;  %v2716_v27 = vld [vmem:[%s5779_s9 + $0x120] sm:$0xff]  ;;  %v2715_v40 = vld [vmem:[%s5779_s9 + $0x118] sm:$0xff] }
 0x6a0   :  { %2587 = vmatprep.subr.mxu1 %v2466_v25  ;;  %2991 = vmatmul.mubr.msk.f32.gmra.mxu1 %vm2475_vm14, %v2456_v22  ;;  %v2730_v25 = vld [vmem:[%s5779_s9 + $0x190] sm:$0xff] }
 0x6a1   :  { %2588 = vmatpush1.msra.mxu1 %v2465_v48  ;;  %2623 = vmatprep.mubr.f32.mxu1 %v3397_v4  ;;  %v2729_v48 = vld [vmem:[%s5779_s9 + $0x188] sm:$0xff] }
 0x6a2   :  { %2589 = vmatprep.subr.mxu1 %v2462_v21  ;;  %3240 = vmatprep.subr.mxu0 %v2733_v32  ;;  %v2713_v21 = vld [vmem:[%s5779_s9 + $0x108] sm:$0xff] }
 0x6a3   :  { %2590 = vmatpush1.msra.mxu1 %v2461_v18  ;;  %v2728_v18 = vld [vmem:[%s5779_s9 + $0x180] sm:$0xff] }
 0x6a4   :  { %2992 = vmatmul.mubr.msk.f32.vlgmr.msra.gmra.mxu1 %vm2475_vm14, %v2451_v55  ;;  %3185 = vmatprep.subr.mxu1 %v2711_v44  ;;  %v2717_v55 = vld [vmem:[%s5779_s9 + $0x128] sm:$0xff]  ;;  %v2712_v44 = vld [vmem:[%s5779_s9 + $0x100] sm:$0xff] }
 0x6a5   :  { %2629 = vmatprep.mubr.f32.mxu1 %v3397_v4  ;;  %3186 = vmatpush3.msra.mxu1 %v2695_v50 }
 0x6a6   :  { %3187 = vmatprep.subr.mxu1 %v2710_v14  ;;  %3241 = vmatpush3.msra.mxu0 %v2717_v55  ;;  %v2636_v14 = vld [vmem:[%s5780_s8] sm:$0xff] }
 0x6a7   :  { %3188 = vmatpush3.msra.mxu1 %v2694_v30  ;;  %3242 = vmatprep.subr.mxu0 %v2732_v24  ;;  %v2893_v24 = vld [vmem:[%s5781_s11 + $0x38] sm:$0xff] }
 0x6a8   :  { %2993 = vmatmul.mubr.msk.f32.gmra.mxu1 %vm2475_vm14, %v2456_v22  ;;  %3189 = vmatprep.subr.mxu1 %v2709_v10  ;;  %v2714_v22 = vld [vmem:[%s5779_s9 + $0x110] sm:$0xff]  ;;  %v2640_v10 = vld [vmem:[%s5780_s8 + $0x20] sm:$0xff] }
 0x6a9   :  { %3190 = vmatpush3.msra.mxu1 %v2693_v23  ;;  %3243 = vmatpush3.msra.mxu0 %v2716_v27  ;;  %v2637_v23 = vld [vmem:[%s5780_s8 + $0x8] sm:$0xff] }
 0x6aa   :  { %3191 = vmatprep.subr.mxu1 %v2708_v39  ;;  %3244 = vmatprep.subr.mxu0 %v2731_v43  ;;  %v2891_v27 = vld [vmem:[%s5781_s11 + $0x28] sm:$0xff]  ;;  %v2890_v43 = vld [vmem:[%s5781_s11 + $0x20] sm:$0xff] }
 0x6ab   :  { %3192 = vmatpush3.msra.mxu1 %v2692_v5  ;;  %3245 = vmatpush3.msra.mxu0 %v2715_v40  ;;  %v2641_v5 = vld [vmem:[%s5780_s8 + $0x28] sm:$0xff]  ;;  %v2889_v40 = vld [vmem:[%s5781_s11 + $0x18] sm:$0xff] }
 0x6ac   :  { %3193 = vmatprep.subr.mxu1 %v2707_v17  ;;  %3246 = vmatprep.subr.mxu0 %v2730_v25  ;;  %v2888_v25 = vld [vmem:[%s5781_s11 + $0x10] sm:$0xff] }
 0x6ad   :  { %3194 = vmatpush3.msra.mxu1 %v2691_v58  ;;  %3247 = vmatpush3.msra.mxu0 %v2714_v22  ;;  %v2887_v22 = vld [vmem:[%s5781_s11 + $0x8] sm:$0xff] }
 0x6ae   :  { %3195 = vmatprep.subr.mxu1 %v2706_v12  ;;  %3248 = vmatprep.subr.mxu0 %v2729_v48  ;;  %v2886_v48 = vld [vmem:[%s5781_s11] sm:$0xff] }
 0x6af   :  { %3196 = vmatpush3.msra.mxu1 %v2690_v59  ;;  %3249 = vmatpush3.msra.mxu0 %v2713_v21 }
 0x6b0   :  { %3197 = vmatprep.subr.mxu1 %v2705_v46  ;;  %3250 = vmatprep.subr.mxu0 %v2728_v18 }
 0x6b1   :  { %3198 = vmatpush3.msra.mxu1 %v2689_v47  ;;  %3251 = vmatpush3.msra.mxu0 %v2712_v44 }
 0x6b2   :  { %3199 = vmatprep.subr.mxu1 %v2704_v35 }
 0x6b3   :  { %3200 = vmatpush3.msra.mxu1 %v2688_v11  ;;  %v2639_v11 = vld [vmem:[%s5780_s8 + $0x18] sm:$0xff] }
 0x6b4   :  { %3201 = vmatprep.subr.mxu1 %v2703_v57  ;;  %v2643_v57 = vld [vmem:[%s5780_s8 + $0x38] sm:$0xff] }
 0x6b5   :  { %3202 = vmatpush3.msra.mxu1 %v2687_v36 }
 0x6b6   :  { %3203 = vmatprep.subr.mxu1 %v2702_v34 }
 0x6b7   :  { %3204 = vmatpush3.msra.mxu1 %v2686_v20 }
 0x6b8   :  { %3205 = vmatprep.subr.mxu1 %v2701_v61 }
 0x6b9   :  { %3206 = vmatpush3.msra.mxu1 %v2685_v53 }
 0x6ba   :  { %3207 = vmatprep.subr.mxu1 %v2700_v19 }
 0x6bb   :  { %3208 = vmatpush3.msra.mxu1 %v2684_v54 }
 0x6bc   :  { %3209 = vmatprep.subr.mxu1 %v2699_v6 }
 0x6bd   :  { %3210 = vmatpush3.msra.mxu1 %v2683_v37 }
 0x6be   :  { %3211 = vmatprep.subr.mxu1 %v2698_v51 }
 0x6bf   :  { %3212 = vmatpush3.msra.mxu1 %v2682_v1 }
 0x6c0   :  { %3213 = vmatprep.subr.mxu1 %v2697_v0 }
 0x6c1   :  { %3214 = vmatpush3.msra.mxu1 %v2681_v7 }
 0x6c2   :  { %3215 = vmatprep.subr.mxu1 %v2696_v38 }
 0x6c3   :  { %3216 = vmatpush3.msra.mxu1 %v2680_v31  ;;  %v2892_v31 = vld [vmem:[%s5781_s11 + $0x30] sm:$0xff] }
 0x6c4   :  { %3264 = vmatprep.subr.mxu1 %v3397_v4 }
 0x75c   :  { %v2548_v50 = vpop.f32.mrf.mxu1 }
 0x75d   :  { %v2644_v17 = vmul.f32 %v2636_v14, %v2548_v50  ;;  %v2744_v50 = vld [vmem:[%s5782_s10] sm:$0x1] }
 0x75e   :  { %v2550_v30 = vpop.f32.mrf.mxu1 }
 0x75f   :  { %v2645_v9 = vmul.f32 %v2637_v23, %v2550_v30 }
 0x760   :  { %v2554_v39 = vpop.f32.mrf.mxu1 }
 0x761   :  { %v2648_v52 = vmul.f32 %v2640_v10, %v2554_v39 }
 0x762   :  { %v2556_v58 = vpop.f32.mrf.mxu1 }
 0x763   :  { %v2652_v12 = vadd.f32 %v2648_v52, %v2644_v17  ;;  %v2649_v13 = vmul.f32 %v2641_v5, %v2556_v58 }
 0x764   :  { %v2625_v59 = vpop.f32.mrf.mxu1 }
 0x765   :  { %v2653_v42 = vrot.slane %v2652_v12, 4  ;;  %v2659_v46 = vadd.f32 %v2649_v13, %v2645_v9  ;;  %v2646_v15 = vmul.f32 %v2638_v3, %v2625_v59 }
 0x766   :  { %v2627_v47 = vpop.f32.mrf.mxu1 }
 0x767   :  { %v2654_v35 = vadd.f32 %v2653_v42, %v2652_v12  ;;  %v2660_v29 = vrot.slane %v2659_v46, 4  ;;  %v2647_v26 = vmul.f32 %v2639_v11, %v2627_v47 }
 0x768   :  { %v2631_v56 = vpop.f32.mrf.mxu1 }
 0x769   :  { %v2655_v16 = vrot.slane %v2654_v35, 2  ;;  %v2661_v36 = vadd.f32 %v2660_v29, %v2659_v46  ;;  %v2650_v34 = vmul.f32 %v2642_v41, %v2631_v56 }
 0x76a   :  { %v2633_v20 = vpop.f32.mrf.mxu1 }
 0x76b   :  { %v2656_v2 = vadd.f32 %v2655_v16, %v2654_v35  ;;  %v2662_v61 = vrot.slane %v2661_v36, 2  ;;  %v2666_v28 = vadd.f32 %v2650_v34, %v2646_v15  ;;  %v2651_v53 = vmul.f32 %v2643_v57, %v2633_v20 }
 0x76d   :  { %v2667_v60 = vrot.slane %v2666_v28, 4  ;;  %v2673_v19 = vadd.f32 %v2651_v53, %v2647_v26  ;;  %v2663_v45 = vadd.f32 %v2662_v61, %v2661_v36  ;;  %v2657_v54 = vrot.slane %v2656_v2, 1 }
 0x76f   :  { %v2668_v49 = vadd.f32 %v2667_v60, %v2666_v28  ;;  %v2674_v6 = vrot.slane %v2673_v19, 4  ;;  %v2664_v62 = vrot.slane %v2663_v45, 1  ;;  %v2658_v8 = vadd.f32 %v2657_v54, %v2656_v2 }
 0x771   :  { %v2669_v37 = vrot.slane %v2668_v49, 2  ;;  %v2675_v63 = vadd.f32 %v2674_v6, %v2673_v19  ;;  %v2665_v51 = vadd.f32 %v2664_v62, %v2663_v45 }
 0x773   :  { %v2670_v1 = vadd.f32 %v2669_v37, %v2668_v49  ;;  %v2676_v33 = vrot.slane %v2675_v63, 2  ;;  %2809 = vmatprep.mubr.f32.mxu1 %v2665_v51 }
 0x774   :  { %2810 = vmatmul.mubr.f32.vlgmr.msra.gmra.mxu1 %v2658_v8 }
 0x775   :  { %v2677_v0 = vadd.f32 %v2676_v33, %v2675_v63  ;;  %v2671_v32 = vrot.slane %v2670_v1, 1  ;;  %3265 = vmatpush3.msra.mxu1 %v2893_v24  ;;  %3280 = vmatprep.mubr.msk.f32.mxu1 %vm3406_vm15, %v3397_v4 }
 0x776   :  { %3266 = vmatprep.subr.mxu1 %v3397_v4 }
 0x777   :  { %v2678_v7 = vrot.slane %v2677_v0, 1  ;;  %v2672_v38 = vadd.f32 %v2671_v32, %v2670_v1  ;;  %3267 = vmatpush3.msra.mxu1 %v2892_v31 }
 0x778   :  { %3268 = vmatprep.subr.mxu1 %v3397_v4 }
 0x779   :  { %v2679_v55 = vadd.f32 %v2678_v7, %v2677_v0  ;;  %3269 = vmatpush3.msra.mxu1 %v2891_v27 }
 0x77a   :  { %3270 = vmatprep.subr.mxu1 %v3397_v4 }
 0x77b   :  { %2879 = vmatprep.mubr.f32.mxu0 %v2679_v55  ;;  %3271 = vmatpush3.msra.mxu1 %v2890_v43 }
 0x77c   :  { %2880 = vmatmul.mubr.f32.vlgmr.msra.gmra.mxu0 %v2672_v38  ;;  %3272 = vmatprep.subr.mxu1 %v3397_v4 }
 0x77d   :  { %3273 = vmatpush3.msra.mxu1 %v2889_v40 }
 0x77e   :  { %3274 = vmatprep.subr.mxu1 %v3397_v4 }
 0x77f   :  { %3275 = vmatpush3.msra.mxu1 %v2888_v25 }
 0x780   :  { %3276 = vmatprep.subr.mxu1 %v3397_v4 }
 0x781   :  { %3277 = vmatpush3.msra.mxu1 %v2887_v22 }
 0x782   :  { %3278 = vmatprep.subr.mxu1 %v3397_v4  ;;  %v2894_v4 = vld [vmem:[%s5783_s12] sm:$0x1] }
 0x783   :  { %3279 = vmatpush3.msra.mxu1 %v2886_v48 }
 0x834   :  { %v3217_v21 = vpop.f32.mrf.mxu1 }
 0x836   :  { %v3218_v18 = vpop.f32.mrf.mxu1 }
 0x837   :  { %v3219_v44 = vadd.f32 %v3218_v18, %v3217_v21 }
 0x839   :  { %v2812_v10 = vadd.f32 %v3219_v44, %v2744_v50 }
 0x83c   :  { %v3252_v14 = vpop.f32.mrf.mxu0 }
 0x83e   :  { %v3253_v30 = vpop.f32.mrf.mxu0 }
 0x83f   :  { %v3254_v23 = vadd.f32 %v3253_v30, %v3252_v14 }
 0x841   :  { %v2882_v39 = vadd.f32 %v3254_v23, %v2812_v10 }
 0x843   :  { %v2885_v5 = vmax.f32 %v2882_v39, 0.0 }
 0x845   :  { %3281 = vmatmul.mubr.msk.f32.vlgmr.msra.gmra.mxu1 %vm2895_vm0, %v2885_v5 }
 0x905   :  { %v2965_v17 = vpop.f32.mrf.mxu1 }
 0x906   :  { %v2966_v52 = vadd.f32 %v2965_v17, %v2894_v4 }
 0x907   :  { %v3282_v58 = vpop.f32.mrf.mxu1 }
 0x908   :  { %2970 = vst.msk [vmem:[%s5784_s13] sm:$0x1] %vm2969_vm1, %v2966_v52 }

</bundles_post_ra>
